<compile_context>
chip_gen: v7x
topology: tpu7x:2x2x1
jax: 0.10.0
libtpu: 0.0.40
codegen_flags: <defaults>
</compile_context>

<pallas_src>
import jax
import jax.numpy as jnp
from jax.experimental import pallas as pl
from jax.experimental.pallas import tpu as pltpu

HIDDEN = 256


def _td3_critic_kernel(s_ref, a_ref,
                       w1sa_s_ref, w1sa_a_ref, b14_ref,
                       w2_ref, b2_ref,
                       w5_ref, b5_ref,
                       w36_ref, b36_ref,
                       q_ref):
    cdt = w2_ref.dtype  # compute dtype of weights (f32 or bf16)

    # ---- Fused layer 1 (both heads), torch.cat folded into two dots ----
    hg = jnp.dot(s_ref[...], w1sa_s_ref[...], preferred_element_type=jnp.float32)
    hg = hg + jnp.dot(a_ref[...], w1sa_a_ref[...], preferred_element_type=jnp.float32)
    hg = jnp.maximum(hg + b14_ref[...], 0.0)                    # (B, 512) f32

    # ---- Layer 2, per head (lane-tile-aligned slices at 256) ----
    h = jnp.dot(hg[:, :HIDDEN].astype(cdt), w2_ref[...],
                preferred_element_type=jnp.float32)
    h = jnp.maximum(h + b2_ref[...], 0.0)                       # (B, 256)
    g = jnp.dot(hg[:, HIDDEN:].astype(cdt), w5_ref[...],
                preferred_element_type=jnp.float32)
    g = jnp.maximum(g + b5_ref[...], 0.0)                       # (B, 256)

    # ---- Layer 3: block-structured (512, 2) weight consumed via two static,
    # sublane-aligned ref slices — no (B, 512) in-kernel concat / VMEM copy.
    # Column 0 of w36[:256] is w3 (column 1 is zeros); column 1 of w36[256:]
    # is w6 (column 0 is zeros), so the sum is exactly [h@w3, g@w6].
    q = jnp.dot(h.astype(cdt), w36_ref[:HIDDEN, :],
                preferred_element_type=jnp.float32)
    q = q + jnp.dot(g.astype(cdt), w36_ref[HIDDEN:, :],
                    preferred_element_type=jnp.float32)
    q_ref[...] = (q + b36_ref[...]).astype(q_ref.dtype)         # (B, 2)


def prepare_td3_critic_params(params, input_dim, param_dtype=jnp.float32):
    """One-time layout hoist from PyTorch-style params {w1..w6 (out,in), b1..b6}.

    Pre-transposes weights to (in, out), splits layer-1 rows into state/action
    parts, fuses the two heads' layer-1 and layer-3 weights, reshapes biases to
    (1, out), and optionally casts weights to bf16 (biases stay f32).
    Note: on v5e (no bf16 VPU) prefer the default float32 params; bf16 mainly
    helps weight DMA on v6e/v7x and quantizes activations too."""
    d = params["w1"].shape[1]
    assert params["w1"].shape == (HIDDEN, d), "w1 must be (256, input+action)"
    assert params["w4"].shape == (HIDDEN, d), "w4 must match w1's shape"
    assert 0 < input_dim < d, (
        f"input_dim={input_dim} must split the {d}-wide [state; action] rows")

    wt = lambda name: params[name].T.astype(param_dtype)        # (in, out)

    w1, w4 = wt("w1"), wt("w4")                                 # (d, 256) each
    w1sa_s = jnp.concatenate([w1[:input_dim], w4[:input_dim]], axis=1)   # (in_dim, 512)
    w1sa_a = jnp.concatenate([w1[input_dim:], w4[input_dim:]], axis=1)   # (act_dim, 512)
    b14 = jnp.concatenate([params["b1"], params["b4"]]).reshape(1, -1).astype(jnp.float32)

    w2, w5 = wt("w2"), wt("w5")                                 # (256, 256)
    b2 = params["b2"].reshape(1, -1).astype(jnp.float32)
    b5 = params["b5"].reshape(1, -1).astype(jnp.float32)

    w3t, w6t = wt("w3"), wt("w6")                               # (256, 1)
    zeros = jnp.zeros((HIDDEN, 1), param_dtype)
    w36 = jnp.concatenate(
        [jnp.concatenate([w3t, zeros], axis=0),                 # column 0 -> q1
         jnp.concatenate([zeros, w6t], axis=0)], axis=1)        # column 1 -> q2
    b36 = jnp.concatenate([params["b3"], params["b6"]]).reshape(1, 2).astype(jnp.float32)

    return dict(w1sa_s=w1sa_s, w1sa_a=w1sa_a, b14=b14,
                w2=w2, b2=b2, w5=w5, b5=b5, w36=w36, b36=b36)


def _num_tensorcores():
    """2 for dual-TensorCore chips (v7x); 1 for single-TC v5e/v6e (or unknown)."""
    try:
        kind = (getattr(jax.devices()[0], "device_kind", "") or "").lower()
    except Exception:
        return 1
    if "v7" in kind or "7x" in kind:
        return 2
    return 1


def td3_critic_forward(state, action, prep, *, max_block_b=1024, num_cores=None):
    """state: [B, input_dim], action: [B, output_dim]. Returns (q1, q2): [B, 1].

    block_b policy: one grid step on single-TC chips, two on dual-TC v7x.
    If you push block_b past ~2048 f32 rows, pass a larger
    pltpu.CompilerParams(vmem_limit_bytes=...) on v5e (16 MiB scoped default)."""
    B = state.shape[0]
    if num_cores is None:
        num_cores = _num_tensorcores()

    # Pad batch to a multiple of 8 sublanes; pick block_b so the grid has
    # exactly `num_cores` steps (1 on v5e/v6e, 2 on v7x), capped by max_block_b.
    b_pad = max(8, -(-B // 8) * 8)
    block_b = max(8, -(-(-(-b_pad // num_cores)) // 8) * 8)     # ceil(b_pad/cores) -> x8
    block_b = min(block_b, max_block_b)
    b_pad = -(-b_pad // block_b) * block_b
    if b_pad != B:
        pad = ((0, b_pad - B), (0, 0))
        state = jnp.pad(state, pad)
        action = jnp.pad(action, pad)

    cdt = prep["w2"].dtype
    state = state.astype(cdt)
    action = action.astype(cdt)
    in_dim, act_dim = state.shape[1], action.shape[1]
    d = in_dim + act_dim

    grid = (b_pad // block_b,)

    # Advisory cost so XLA schedules the surrounding pad/slice ops sensibly.
    weight_bytes = sum(int(prep[k].size) * prep[k].dtype.itemsize for k in prep)
    io_bytes = (int(state.size) + int(action.size)) * state.dtype.itemsize + b_pad * 2 * 4
    cost = pl.CostEstimate(
        flops=2 * b_pad * (d * 2 * HIDDEN + 2 * HIDDEN * HIDDEN + 2 * HIDDEN * 2),
        transcendentals=0,
        bytes_accessed=weight_bytes + io_bytes)

    def row_spec(feat):
        return pl.BlockSpec((block_b, feat), lambda i: (i, 0))

    def const_spec(arr, single_buffer):
        # Constant index_map -> never re-fetched; single-buffer to halve the
        # resident weight footprint when the API supports it.
        if single_buffer:
            try:
                return pl.BlockSpec(arr.shape, lambda i: (0, 0),
                                    pipeline_mode=pl.Buffered(1))
            except TypeError:
                pass
        return pl.BlockSpec(arr.shape, lambda i: (0, 0))

    def run(single_buffer):
        call = pl.pallas_call(
            _td3_critic_kernel,
            out_shape=jax.ShapeDtypeStruct((b_pad, 2), jnp.float32),
            grid=grid,
            in_specs=[
                row_spec(in_dim), row_spec(act_dim),
                const_spec(prep["w1sa_s"], single_buffer),
                const_spec(prep["w1sa_a"], single_buffer),
                const_spec(prep["b14"], single_buffer),
                const_spec(prep["w2"], single_buffer),
                const_spec(prep["b2"], single_buffer),
                const_spec(prep["w5"], single_buffer),
                const_spec(prep["b5"], single_buffer),
                const_spec(prep["w36"], single_buffer),
                const_spec(prep["b36"], single_buffer),
            ],
            out_specs=pl.BlockSpec((block_b, 2), lambda i: (i, 0)),
            compiler_params=pltpu.CompilerParams(
                dimension_semantics=("parallel",)),   # shards batch over v7x's 2 TCs
            cost_estimate=cost,
        )
        return call(state, action,
                    prep["w1sa_s"], prep["w1sa_a"], prep["b14"],
                    prep["w2"], prep["b2"], prep["w5"], prep["b5"],
                    prep["w36"], prep["b36"])

    try:
        q = run(True)
    except Exception:
        # Fall back to default (double-buffered) weight specs if this JAX/Mosaic
        # build rejects pipeline_mode on top-level pallas_call BlockSpecs.
        q = run(False)

    return q[:B, 0:1], q[:B, 1:2]


def init_td3_critic_params(key, input_dim, output_dim):
    """PyTorch-style params: w (out, in), b (out,), U[-1/sqrt(fan_in), 1/sqrt(fan_in)]."""
    d = input_dim + output_dim
    dims = [(d, HIDDEN), (HIDDEN, HIDDEN), (HIDDEN, 1),
            (d, HIDDEN), (HIDDEN, HIDDEN), (HIDDEN, 1)]
    params = {}
    keys = jax.random.split(key, 2 * len(dims))
    for i, (fan_in, fan_out) in enumerate(dims, start=1):
        bound = 1.0 / jnp.sqrt(fan_in)
        params[f"w{i}"] = jax.random.uniform(
            keys[2 * (i - 1)], (fan_out, fan_in), jnp.float32, -bound, bound)
        params[f"b{i}"] = jax.random.uniform(
            keys[2 * (i - 1) + 1], (fan_out,), jnp.float32, -bound, bound)
    return params


def _reference_forward(state, action, params):
    sa = jnp.concatenate([state, action], axis=1)

    def head(i1, i2, i3):
        h = jax.nn.relu(sa @ params[f"w{i1}"].T + params[f"b{i1}"])
        h = jax.nn.relu(h @ params[f"w{i2}"].T + params[f"b{i2}"])
        return h @ params[f"w{i3}"].T + params[f"b{i3}"]

    return head(1, 2, 3), head(4, 5, 6)


if __name__ == "__main__":
    key = jax.random.PRNGKey(0)
    k_params, k_state, k_action = jax.random.split(key, 3)

    B, input_dim, output_dim = 2, 16, 4
    raw = init_td3_critic_params(k_params, input_dim, output_dim)
    state = jax.random.normal(k_state, (B, input_dim), jnp.float32)
    action = jax.random.normal(k_action, (B, output_dim), jnp.float32)

    r1, r2 = _reference_forward(state, action, raw)

    # f32 params: exact semantics of the PyTorch module.
    prep32 = prepare_td3_critic_params(raw, input_dim, param_dtype=jnp.float32)
    q1, q2 = td3_critic_forward(state, action, prep32)
    q1 = jax.block_until_ready(q1)
    q2 = jax.block_until_ready(q2)
    assert q1.shape == (B, 1) and q2.shape == (B, 1)
    assert jnp.allclose(q1, r1, atol=1e-4, rtol=1e-4)
    assert jnp.allclose(q2, r2, atol=1e-4, rtol=1e-4)

    # Exercise the dual-TC (v7x-style) 2-step parallel grid path explicitly;
    # results must be identical regardless of the batch split.
    q1b, q2b = td3_critic_forward(state, action, prep32, num_cores=2)
    q1b = jax.block_until_ready(q1b)
    q2b = jax.block_until_ready(q2b)
    assert jnp.allclose(q1b, r1, atol=1e-4, rtol=1e-4)
    assert jnp.allclose(q2b, r2, atol=1e-4, rtol=1e-4)

    # Optional bf16 weights/activations (halves weight DMA on v6e/v7x);
    # f32 MXU accumulation keeps the result close to the f32 reference.
    # Note: this quantizes activations too — keep f32 if the critic feeds
    # TD-error targets that are sensitive to ~1e-2 noise (and on v5e).
    prep16 = prepare_td3_critic_params(raw, input_dim, param_dtype=jnp.bfloat16)
    p1, p2 = td3_critic_forward(state, action, prep16)
    p1 = jax.block_until_ready(p1)
    p2 = jax.block_until_ready(p2)
    assert jnp.allclose(p1, r1, atol=5e-2, rtol=1e-1)
    assert jnp.allclose(p2, r2, atol=5e-2, rtol=1e-1)

    print("KERNEL_OK")
</pallas_src>

<mosaic_0001>
module attributes {stable_mosaic.version = 11 : i64} {
  func.func @_td3_critic_kernel(%arg0: i32, %arg1: memref<8x16xf32, #tpu.memory_space<vmem>>, %arg2: memref<8x4xf32, #tpu.memory_space<vmem>>, %arg3: memref<16x512xf32, #tpu.memory_space<vmem>>, %arg4: memref<4x512xf32, #tpu.memory_space<vmem>>, %arg5: memref<1x512xf32, #tpu.memory_space<vmem>>, %arg6: memref<256x256xf32, #tpu.memory_space<vmem>>, %arg7: memref<1x256xf32, #tpu.memory_space<vmem>>, %arg8: memref<256x256xf32, #tpu.memory_space<vmem>>, %arg9: memref<1x256xf32, #tpu.memory_space<vmem>>, %arg10: memref<512x2xf32, #tpu.memory_space<vmem>>, %arg11: memref<1x2xf32, #tpu.memory_space<vmem>>, %arg12: memref<8x2xf32, #tpu.memory_space<vmem>>) attributes {dimension_semantics = [#tpu.dimension_semantics<parallel>], iteration_bounds = array<i64: 1>, scalar_prefetch = 0 : i64, scratch_operands = 0 : i64, tpu.core_type = #tpu.core_type<tc>, window_params = [{transform_indices = @transform_0, window_bounds = array<i64: 8, 16>}, {transform_indices = @transform_1, window_bounds = array<i64: 8, 4>}, {pipeline_mode = #tpu.pipeline_mode<synchronous>, transform_indices = @transform_2, window_bounds = array<i64: 16, 512>}, {pipeline_mode = #tpu.pipeline_mode<synchronous>, transform_indices = @transform_3, window_bounds = array<i64: 4, 512>}, {pipeline_mode = #tpu.pipeline_mode<synchronous>, transform_indices = @transform_4, window_bounds = array<i64: 1, 512>}, {pipeline_mode = #tpu.pipeline_mode<synchronous>, transform_indices = @transform_5, window_bounds = array<i64: 256, 256>}, {pipeline_mode = #tpu.pipeline_mode<synchronous>, transform_indices = @transform_6, window_bounds = array<i64: 1, 256>}, {pipeline_mode = #tpu.pipeline_mode<synchronous>, transform_indices = @transform_7, window_bounds = array<i64: 256, 256>}, {pipeline_mode = #tpu.pipeline_mode<synchronous>, transform_indices = @transform_8, window_bounds = array<i64: 1, 256>}, {pipeline_mode = #tpu.pipeline_mode<synchronous>, transform_indices = @transform_9, window_bounds = array<i64: 512, 2>}, {pipeline_mode = #tpu.pipeline_mode<synchronous>, transform_indices = @transform_10, window_bounds = array<i64: 1, 2>}, {transform_indices = @transform_11, window_bounds = array<i64: 8, 2>}]} {
    %c0 = arith.constant 0 : index
    %c0_0 = arith.constant 0 : index
    %0 = vector.load %arg1[%c0, %c0_0] : memref<8x16xf32, #tpu.memory_space<vmem>>, vector<8x16xf32>
    %c0_1 = arith.constant 0 : index
    %c0_2 = arith.constant 0 : index
    %1 = vector.load %arg3[%c0_1, %c0_2] : memref<16x512xf32, #tpu.memory_space<vmem>>, vector<16x512xf32>
    %cst = arith.constant dense<0.000000e+00> : vector<8x512xf32>
    %2 = tpu.matmul %0, %1, %cst {dimension_numbers = #tpu.dot_dimension_numbers<[1], [0], [0], [1], [0, 0, 1, 1], [], []>} : vector<8x16xf32>, vector<16x512xf32>, vector<8x512xf32> -> vector<8x512xf32>
    %c0_3 = arith.constant 0 : index
    %c0_4 = arith.constant 0 : index
    %3 = vector.load %arg2[%c0_3, %c0_4] : memref<8x4xf32, #tpu.memory_space<vmem>>, vector<8x4xf32>
    %c0_5 = arith.constant 0 : index
    %c0_6 = arith.constant 0 : index
    %4 = vector.load %arg4[%c0_5, %c0_6] : memref<4x512xf32, #tpu.memory_space<vmem>>, vector<4x512xf32>
    %cst_7 = arith.constant dense<0.000000e+00> : vector<8x512xf32>
    %5 = tpu.matmul %3, %4, %cst_7 {dimension_numbers = #tpu.dot_dimension_numbers<[1], [0], [0], [1], [0, 0, 1, 1], [], []>} : vector<8x4xf32>, vector<4x512xf32>, vector<8x512xf32> -> vector<8x512xf32>
    %6 = arith.addf %2, %5 : vector<8x512xf32>
    %c0_8 = arith.constant 0 : index
    %c0_9 = arith.constant 0 : index
    %7 = vector.load %arg5[%c0_8, %c0_9] : memref<1x512xf32, #tpu.memory_space<vmem>>, vector<1x512xf32>
    %8 = vector.broadcast %7 : vector<1x512xf32> to vector<8x512xf32>
    %9 = arith.addf %6, %8 : vector<8x512xf32>
    %cst_10 = arith.constant 0.000000e+00 : f32
    %10 = vector.broadcast %cst_10 : f32 to vector<8x512xf32>
    %11 = arith.maximumf %9, %10 : vector<8x512xf32>
    %12 = vector.extract_strided_slice %11 {offsets = [0, 0], sizes = [8, 256], strides = [1, 1]} : vector<8x512xf32> to vector<8x256xf32>
    %c0_11 = arith.constant 0 : index
    %c0_12 = arith.constant 0 : index
    %13 = vector.load %arg6[%c0_11, %c0_12] : memref<256x256xf32, #tpu.memory_space<vmem>>, vector<256x256xf32>
    %cst_13 = arith.constant dense<0.000000e+00> : vector<8x256xf32>
    %14 = tpu.matmul %12, %13, %cst_13 {dimension_numbers = #tpu.dot_dimension_numbers<[1], [0], [0], [1], [0, 0, 1, 1], [], []>} : vector<8x256xf32>, vector<256x256xf32>, vector<8x256xf32> -> vector<8x256xf32>
    %c0_14 = arith.constant 0 : index
    %c0_15 = arith.constant 0 : index
    %15 = vector.load %arg7[%c0_14, %c0_15] : memref<1x256xf32, #tpu.memory_space<vmem>>, vector<1x256xf32>
    %16 = vector.broadcast %15 : vector<1x256xf32> to vector<8x256xf32>
    %17 = arith.addf %14, %16 : vector<8x256xf32>
    %cst_16 = arith.constant 0.000000e+00 : f32
    %18 = vector.broadcast %cst_16 : f32 to vector<8x256xf32>
    %19 = arith.maximumf %17, %18 : vector<8x256xf32>
    %20 = vector.extract_strided_slice %11 {offsets = [0, 256], sizes = [8, 256], strides = [1, 1]} : vector<8x512xf32> to vector<8x256xf32>
    %c0_17 = arith.constant 0 : index
    %c0_18 = arith.constant 0 : index
    %21 = vector.load %arg8[%c0_17, %c0_18] : memref<256x256xf32, #tpu.memory_space<vmem>>, vector<256x256xf32>
    %cst_19 = arith.constant dense<0.000000e+00> : vector<8x256xf32>
    %22 = tpu.matmul %20, %21, %cst_19 {dimension_numbers = #tpu.dot_dimension_numbers<[1], [0], [0], [1], [0, 0, 1, 1], [], []>} : vector<8x256xf32>, vector<256x256xf32>, vector<8x256xf32> -> vector<8x256xf32>
    %c0_20 = arith.constant 0 : index
    %c0_21 = arith.constant 0 : index
    %23 = vector.load %arg9[%c0_20, %c0_21] : memref<1x256xf32, #tpu.memory_space<vmem>>, vector<1x256xf32>
    %24 = vector.broadcast %23 : vector<1x256xf32> to vector<8x256xf32>
    %25 = arith.addf %22, %24 : vector<8x256xf32>
    %cst_22 = arith.constant 0.000000e+00 : f32
    %26 = vector.broadcast %cst_22 : f32 to vector<8x256xf32>
    %27 = arith.maximumf %25, %26 : vector<8x256xf32>
    %c0_23 = arith.constant 0 : index
    %c0_24 = arith.constant 0 : index
    %28 = vector.load %arg10[%c0_23, %c0_24] : memref<512x2xf32, #tpu.memory_space<vmem>>, vector<256x2xf32>
    %cst_25 = arith.constant dense<0.000000e+00> : vector<8x2xf32>
    %29 = tpu.matmul %19, %28, %cst_25 {dimension_numbers = #tpu.dot_dimension_numbers<[1], [0], [0], [1], [0, 0, 1, 1], [], []>} : vector<8x256xf32>, vector<256x2xf32>, vector<8x2xf32> -> vector<8x2xf32>
    %c256 = arith.constant 256 : index
    %c0_26 = arith.constant 0 : index
    %30 = vector.load %arg10[%c256, %c0_26] : memref<512x2xf32, #tpu.memory_space<vmem>>, vector<256x2xf32>
    %cst_27 = arith.constant dense<0.000000e+00> : vector<8x2xf32>
    %31 = tpu.matmul %27, %30, %cst_27 {dimension_numbers = #tpu.dot_dimension_numbers<[1], [0], [0], [1], [0, 0, 1, 1], [], []>} : vector<8x256xf32>, vector<256x2xf32>, vector<8x2xf32> -> vector<8x2xf32>
    %32 = arith.addf %29, %31 : vector<8x2xf32>
    %c0_28 = arith.constant 0 : index
    %c0_29 = arith.constant 0 : index
    %33 = vector.load %arg11[%c0_28, %c0_29] : memref<1x2xf32, #tpu.memory_space<vmem>>, vector<1x2xf32>
    %34 = vector.broadcast %33 : vector<1x2xf32> to vector<8x2xf32>
    %35 = arith.addf %32, %34 : vector<8x2xf32>
    %c0_30 = arith.constant 0 : index
    %c0_31 = arith.constant 0 : index
    %36 = vector.load %arg12[%c0_30, %c0_31] : memref<8x2xf32, #tpu.memory_space<vmem>>, vector<8x2xf32>
    tpu.vector_store %arg12[%c0_30, %c0_31], %35 {strides = array<i32>} : memref<8x2xf32, #tpu.memory_space<vmem>>, vector<8x2xf32>,
    return
  }
  func.func @transform_0(%arg0: i32) -> (i32, i32) {
    %c0_i32 = arith.constant 0 : i32
    %c0_i32_0 = arith.constant 0 : i32
    return %arg0, %c0_i32 : i32, i32
  }
  func.func @transform_1(%arg0: i32) -> (i32, i32) {
    %c0_i32 = arith.constant 0 : i32
    %c0_i32_0 = arith.constant 0 : i32
    return %arg0, %c0_i32 : i32, i32
  }
  func.func @transform_2(%arg0: i32) -> (i32, i32) {
    %c0_i32 = arith.constant 0 : i32
    %c0_i32_0 = arith.constant 0 : i32
    %c0_i32_1 = arith.constant 0 : i32
    return %c0_i32, %c0_i32_0 : i32, i32
  }
  func.func @transform_3(%arg0: i32) -> (i32, i32) {
    %c0_i32 = arith.constant 0 : i32
    %c0_i32_0 = arith.constant 0 : i32
    %c0_i32_1 = arith.constant 0 : i32
    return %c0_i32, %c0_i32_0 : i32, i32
  }
  func.func @transform_4(%arg0: i32) -> (i32, i32) {
    %c0_i32 = arith.constant 0 : i32
    %c0_i32_0 = arith.constant 0 : i32
    %c0_i32_1 = arith.constant 0 : i32
    return %c0_i32, %c0_i32_0 : i32, i32
  }
  func.func @transform_5(%arg0: i32) -> (i32, i32) {
    %c0_i32 = arith.constant 0 : i32
    %c0_i32_0 = arith.constant 0 : i32
    %c0_i32_1 = arith.constant 0 : i32
    return %c0_i32, %c0_i32_0 : i32, i32
  }
  func.func @transform_6(%arg0: i32) -> (i32, i32) {
    %c0_i32 = arith.constant 0 : i32
    %c0_i32_0 = arith.constant 0 : i32
    %c0_i32_1 = arith.constant 0 : i32
    return %c0_i32, %c0_i32_0 : i32, i32
  }
  func.func @transform_7(%arg0: i32) -> (i32, i32) {
    %c0_i32 = arith.constant 0 : i32
    %c0_i32_0 = arith.constant 0 : i32
    %c0_i32_1 = arith.constant 0 : i32
    return %c0_i32, %c0_i32_0 : i32, i32
  }
  func.func @transform_8(%arg0: i32) -> (i32, i32) {
    %c0_i32 = arith.constant 0 : i32
    %c0_i32_0 = arith.constant 0 : i32
    %c0_i32_1 = arith.constant 0 : i32
    return %c0_i32, %c0_i32_0 : i32, i32
  }
  func.func @transform_9(%arg0: i32) -> (i32, i32) {
    %c0_i32 = arith.constant 0 : i32
    %c0_i32_0 = arith.constant 0 : i32
    %c0_i32_1 = arith.constant 0 : i32
    return %c0_i32, %c0_i32_0 : i32, i32
  }
  func.func @transform_10(%arg0: i32) -> (i32, i32) {
    %c0_i32 = arith.constant 0 : i32
    %c0_i32_0 = arith.constant 0 : i32
    %c0_i32_1 = arith.constant 0 : i32
    return %c0_i32, %c0_i32_0 : i32, i32
  }
  func.func @transform_11(%arg0: i32) -> (i32, i32) {
    %c0_i32 = arith.constant 0 : i32
    %c0_i32_0 = arith.constant 0 : i32
    return %arg0, %c0_i32 : i32, i32
  }
}

module attributes {stable_mosaic.version = 11 : i64} {
  func.func @_td3_critic_kernel(%arg0: i32, %arg1: memref<8x16xf32, #tpu.memory_space<vmem>>, %arg2: memref<8x4xf32, #tpu.memory_space<vmem>>, %arg3: memref<16x512xf32, #tpu.memory_space<vmem>>, %arg4: memref<4x512xf32, #tpu.memory_space<vmem>>, %arg5: memref<1x512xf32, #tpu.memory_space<vmem>>, %arg6: memref<256x256xf32, #tpu.memory_space<vmem>>, %arg7: memref<1x256xf32, #tpu.memory_space<vmem>>, %arg8: memref<256x256xf32, #tpu.memory_space<vmem>>, %arg9: memref<1x256xf32, #tpu.memory_space<vmem>>, %arg10: memref<512x2xf32, #tpu.memory_space<vmem>>, %arg11: memref<1x2xf32, #tpu.memory_space<vmem>>, %arg12: memref<8x2xf32, #tpu.memory_space<vmem>>) attributes {dimension_semantics = [#tpu.dimension_semantics<parallel>], iteration_bounds = array<i64: 1>, scalar_prefetch = 0 : i64, scratch_operands = 0 : i64, tpu.core_type = #tpu.core_type<tc>, window_params = [{transform_indices = @transform_0, window_bounds = array<i64: 8, 16>}, {transform_indices = @transform_1, window_bounds = array<i64: 8, 4>}, {pipeline_mode = #tpu.pipeline_mode<synchronous>, transform_indices = @transform_2, window_bounds = array<i64: 16, 512>}, {pipeline_mode = #tpu.pipeline_mode<synchronous>, transform_indices = @transform_3, window_bounds = array<i64: 4, 512>}, {pipeline_mode = #tpu.pipeline_mode<synchronous>, transform_indices = @transform_4, window_bounds = array<i64: 1, 512>}, {pipeline_mode = #tpu.pipeline_mode<synchronous>, transform_indices = @transform_5, window_bounds = array<i64: 256, 256>}, {pipeline_mode = #tpu.pipeline_mode<synchronous>, transform_indices = @transform_6, window_bounds = array<i64: 1, 256>}, {pipeline_mode = #tpu.pipeline_mode<synchronous>, transform_indices = @transform_7, window_bounds = array<i64: 256, 256>}, {pipeline_mode = #tpu.pipeline_mode<synchronous>, transform_indices = @transform_8, window_bounds = array<i64: 1, 256>}, {pipeline_mode = #tpu.pipeline_mode<synchronous>, transform_indices = @transform_9, window_bounds = array<i64: 512, 2>}, {pipeline_mode = #tpu.pipeline_mode<synchronous>, transform_indices = @transform_10, window_bounds = array<i64: 1, 2>}, {transform_indices = @transform_11, window_bounds = array<i64: 8, 2>}]} {
    %c0 = arith.constant 0 : index
    %c0_0 = arith.constant 0 : index
    %0 = vector.load %arg1[%c0, %c0_0] : memref<8x16xf32, #tpu.memory_space<vmem>>, vector<8x16xf32>
    %c0_1 = arith.constant 0 : index
    %c0_2 = arith.constant 0 : index
    %1 = vector.load %arg3[%c0_1, %c0_2] : memref<16x512xf32, #tpu.memory_space<vmem>>, vector<16x512xf32>
    %cst = arith.constant dense<0.000000e+00> : vector<8x512xf32>
    %2 = tpu.matmul %0, %1, %cst {dimension_numbers = #tpu.dot_dimension_numbers<[1], [0], [0], [1], [0, 0, 1, 1], [], []>} : vector<8x16xf32>, vector<16x512xf32>, vector<8x512xf32> -> vector<8x512xf32>
    %c0_3 = arith.constant 0 : index
    %c0_4 = arith.constant 0 : index
    %3 = vector.load %arg2[%c0_3, %c0_4] : memref<8x4xf32, #tpu.memory_space<vmem>>, vector<8x4xf32>
    %c0_5 = arith.constant 0 : index
    %c0_6 = arith.constant 0 : index
    %4 = vector.load %arg4[%c0_5, %c0_6] : memref<4x512xf32, #tpu.memory_space<vmem>>, vector<4x512xf32>
    %cst_7 = arith.constant dense<0.000000e+00> : vector<8x512xf32>
    %5 = tpu.matmul %3, %4, %cst_7 {dimension_numbers = #tpu.dot_dimension_numbers<[1], [0], [0], [1], [0, 0, 1, 1], [], []>} : vector<8x4xf32>, vector<4x512xf32>, vector<8x512xf32> -> vector<8x512xf32>
    %6 = arith.addf %2, %5 : vector<8x512xf32>
    %c0_8 = arith.constant 0 : index
    %c0_9 = arith.constant 0 : index
    %7 = vector.load %arg5[%c0_8, %c0_9] : memref<1x512xf32, #tpu.memory_space<vmem>>, vector<1x512xf32>
    %8 = vector.broadcast %7 : vector<1x512xf32> to vector<8x512xf32>
    %9 = arith.addf %6, %8 : vector<8x512xf32>
    %cst_10 = arith.constant 0.000000e+00 : f32
    %10 = vector.broadcast %cst_10 : f32 to vector<8x512xf32>
    %11 = arith.maximumf %9, %10 : vector<8x512xf32>
    %12 = vector.extract_strided_slice %11 {offsets = [0, 0], sizes = [8, 256], strides = [1, 1]} : vector<8x512xf32> to vector<8x256xf32>
    %c0_11 = arith.constant 0 : index
    %c0_12 = arith.constant 0 : index
    %13 = vector.load %arg6[%c0_11, %c0_12] : memref<256x256xf32, #tpu.memory_space<vmem>>, vector<256x256xf32>
    %cst_13 = arith.constant dense<0.000000e+00> : vector<8x256xf32>
    %14 = tpu.matmul %12, %13, %cst_13 {dimension_numbers = #tpu.dot_dimension_numbers<[1], [0], [0], [1], [0, 0, 1, 1], [], []>} : vector<8x256xf32>, vector<256x256xf32>, vector<8x256xf32> -> vector<8x256xf32>
    %c0_14 = arith.constant 0 : index
    %c0_15 = arith.constant 0 : index
    %15 = vector.load %arg7[%c0_14, %c0_15] : memref<1x256xf32, #tpu.memory_space<vmem>>, vector<1x256xf32>
    %16 = vector.broadcast %15 : vector<1x256xf32> to vector<8x256xf32>
    %17 = arith.addf %14, %16 : vector<8x256xf32>
    %cst_16 = arith.constant 0.000000e+00 : f32
    %18 = vector.broadcast %cst_16 : f32 to vector<8x256xf32>
    %19 = arith.maximumf %17, %18 : vector<8x256xf32>
    %20 = vector.extract_strided_slice %11 {offsets = [0, 256], sizes = [8, 256], strides = [1, 1]} : vector<8x512xf32> to vector<8x256xf32>
    %c0_17 = arith.constant 0 : index
    %c0_18 = arith.constant 0 : index
    %21 = vector.load %arg8[%c0_17, %c0_18] : memref<256x256xf32, #tpu.memory_space<vmem>>, vector<256x256xf32>
    %cst_19 = arith.constant dense<0.000000e+00> : vector<8x256xf32>
    %22 = tpu.matmul %20, %21, %cst_19 {dimension_numbers = #tpu.dot_dimension_numbers<[1], [0], [0], [1], [0, 0, 1, 1], [], []>} : vector<8x256xf32>, vector<256x256xf32>, vector<8x256xf32> -> vector<8x256xf32>
    %c0_20 = arith.constant 0 : index
    %c0_21 = arith.constant 0 : index
    %23 = vector.load %arg9[%c0_20, %c0_21] : memref<1x256xf32, #tpu.memory_space<vmem>>, vector<1x256xf32>
    %24 = vector.broadcast %23 : vector<1x256xf32> to vector<8x256xf32>
    %25 = arith.addf %22, %24 : vector<8x256xf32>
    %cst_22 = arith.constant 0.000000e+00 : f32
    %26 = vector.broadcast %cst_22 : f32 to vector<8x256xf32>
    %27 = arith.maximumf %25, %26 : vector<8x256xf32>
    %c0_23 = arith.constant 0 : index
    %c0_24 = arith.constant 0 : index
    %28 = vector.load %arg10[%c0_23, %c0_24] : memref<512x2xf32, #tpu.memory_space<vmem>>, vector<256x2xf32>
    %cst_25 = arith.constant dense<0.000000e+00> : vector<8x2xf32>
    %29 = tpu.matmul %19, %28, %cst_25 {dimension_numbers = #tpu.dot_dimension_numbers<[1], [0], [0], [1], [0, 0, 1, 1], [], []>} : vector<8x256xf32>, vector<256x2xf32>, vector<8x2xf32> -> vector<8x2xf32>
    %c256 = arith.constant 256 : index
    %c0_26 = arith.constant 0 : index
    %30 = vector.load %arg10[%c256, %c0_26] : memref<512x2xf32, #tpu.memory_space<vmem>>, vector<256x2xf32>
    %cst_27 = arith.constant dense<0.000000e+00> : vector<8x2xf32>
    %31 = tpu.matmul %27, %30, %cst_27 {dimension_numbers = #tpu.dot_dimension_numbers<[1], [0], [0], [1], [0, 0, 1, 1], [], []>} : vector<8x256xf32>, vector<256x2xf32>, vector<8x2xf32> -> vector<8x2xf32>
    %32 = arith.addf %29, %31 : vector<8x2xf32>
    %c0_28 = arith.constant 0 : index
    %c0_29 = arith.constant 0 : index
    %33 = vector.load %arg11[%c0_28, %c0_29] : memref<1x2xf32, #tpu.memory_space<vmem>>, vector<1x2xf32>
    %34 = vector.broadcast %33 : vector<1x2xf32> to vector<8x2xf32>
    %35 = arith.addf %32, %34 : vector<8x2xf32>
    %c0_30 = arith.constant 0 : index
    %c0_31 = arith.constant 0 : index
    %36 = vector.load %arg12[%c0_30, %c0_31] : memref<8x2xf32, #tpu.memory_space<vmem>>, vector<8x2xf32>
    tpu.vector_store %arg12[%c0_30, %c0_31], %35 {strides = array<i32>} : memref<8x2xf32, #tpu.memory_space<vmem>>, vector<8x2xf32>,
    return
  }
  func.func @transform_0(%arg0: i32) -> (i32, i32) {
    %c0_i32 = arith.constant 0 : i32
    %c0_i32_0 = arith.constant 0 : i32
    return %arg0, %c0_i32 : i32, i32
  }
  func.func @transform_1(%arg0: i32) -> (i32, i32) {
    %c0_i32 = arith.constant 0 : i32
    %c0_i32_0 = arith.constant 0 : i32
    return %arg0, %c0_i32 : i32, i32
  }
  func.func @transform_2(%arg0: i32) -> (i32, i32) {
    %c0_i32 = arith.constant 0 : i32
    %c0_i32_0 = arith.constant 0 : i32
    %c0_i32_1 = arith.constant 0 : i32
    return %c0_i32, %c0_i32_0 : i32, i32
  }
  func.func @transform_3(%arg0: i32) -> (i32, i32) {
    %c0_i32 = arith.constant 0 : i32
    %c0_i32_0 = arith.constant 0 : i32
    %c0_i32_1 = arith.constant 0 : i32
    return %c0_i32, %c0_i32_0 : i32, i32
  }
  func.func @transform_4(%arg0: i32) -> (i32, i32) {
    %c0_i32 = arith.constant 0 : i32
    %c0_i32_0 = arith.constant 0 : i32
    %c0_i32_1 = arith.constant 0 : i32
    return %c0_i32, %c0_i32_0 : i32, i32
  }
  func.func @transform_5(%arg0: i32) -> (i32, i32) {
    %c0_i32 = arith.constant 0 : i32
    %c0_i32_0 = arith.constant 0 : i32
    %c0_i32_1 = arith.constant 0 : i32
    return %c0_i32, %c0_i32_0 : i32, i32
  }
  func.func @transform_6(%arg0: i32) -> (i32, i32) {
    %c0_i32 = arith.constant 0 : i32
    %c0_i32_0 = arith.constant 0 : i32
    %c0_i32_1 = arith.constant 0 : i32
    return %c0_i32, %c0_i32_0 : i32, i32
  }
  func.func @transform_7(%arg0: i32) -> (i32, i32) {
    %c0_i32 = arith.constant 0 : i32
    %c0_i32_0 = arith.constant 0 : i32
    %c0_i32_1 = arith.constant 0 : i32
    return %c0_i32, %c0_i32_0 : i32, i32
  }
  func.func @transform_8(%arg0: i32) -> (i32, i32) {
    %c0_i32 = arith.constant 0 : i32
    %c0_i32_0 = arith.constant 0 : i32
    %c0_i32_1 = arith.constant 0 : i32
    return %c0_i32, %c0_i32_0 : i32, i32
  }
  func.func @transform_9(%arg0: i32) -> (i32, i32) {
    %c0_i32 = arith.constant 0 : i32
    %c0_i32_0 = arith.constant 0 : i32
    %c0_i32_1 = arith.constant 0 : i32
    return %c0_i32, %c0_i32_0 : i32, i32
  }
  func.func @transform_10(%arg0: i32) -> (i32, i32) {
    %c0_i32 = arith.constant 0 : i32
    %c0_i32_0 = arith.constant 0 : i32
    %c0_i32_1 = arith.constant 0 : i32
    return %c0_i32, %c0_i32_0 : i32, i32
  }
  func.func @transform_11(%arg0: i32) -> (i32, i32) {
    %c0_i32 = arith.constant 0 : i32
    %c0_i32_0 = arith.constant 0 : i32
    return %arg0, %c0_i32 : i32, i32
  }
}

</mosaic_0001>

<bundles_post_ra>
// kernel: tpu_custom_call.1
= control target key start
LH: loop header
LB: loop body
LE: loop exit
PB: predicated region body
PF: predicated region fallthrough
CT: control target
= control target key end

     0   :  { %16 = vsyncpa [#allocation3], 0  ;;  %s1789_s0 = inlined_call_operand.vmem [shape: f32[8,16], index: 0, kind: input, shape index: {}]   ;;  %s1790_s1 = inlined_call_operand.vmem [shape: f32[8,4], index: 1, kind: input, shape index: {}]   ;;  %s1791_s2 = inlined_call_operand.hbm [shape: f32[16,512], index: 2, kind: input, shape index: {}]   ;;  %s1792_s3 = inlined_call_operand.vmem [shape: f32[4,512], index: 3, kind: input, shape index: {}]   ;;  %s1793_s4 = inlined_call_operand.vmem [shape: f32[1,512], index: 4, kind: input, shape index: {}]   ;;  %s1794_s5 = inlined_call_operand.vmem [shape: f32[256,256], index: 5, kind: input, shape index: {}]   ;;  %s1795_s6 = inlined_call_operand.vmem [shape: f32[1,256], index: 6, kind: input, shape index: {}]   ;;  %s1796_s7 = inlined_call_operand.hbm [shape: f32[256,256], index: 7, kind: input, shape index: {}]   ;;  %s1797_s8 = inlined_call_operand.vmem [shape: f32[1,256], index: 8, kind: input, shape index: {}]   ;;  %s1798_s9 = inlined_call_operand.vmem [shape: f32[512,2], index: 9, kind: input, shape index: {}]   ;;  %s1799_s10 = inlined_call_operand.vmem [shape: f32[1,2], index: 10, kind: input, shape index: {}]   ;;  %s1800_s11 = inlined_call_operand.vmem [shape: f32[8,2], index: 11, kind: output, shape index: {}]  }
   0x1   :  { %17 = vsyncpa [#allocation5], 0  ;;  %s1271_s17 = smov [#allocation2]   ;;  %s1223_s21 = scalar_lea.hbm %s1791_s2, 1024 }
   0x2   :  { %s27_s18 = sshll.u32 %s1271_s17, 4  ;;  %p1224_p0 = scmp.ne.s32.totalorder %s1791_s2, %s1223_s21  ;;  %s28_s18 = int_to_ptr.vmem [resolvable:$true] %s27_s18 }
   0x3   :  { %p1227_p1 = scmp.lt.u32.totalorder %s1223_s21, %s1791_s2 }
   0x5   :  { %p1229_p2 = pnand %p1227_p1, %p1224_p0 }
   0x7   :  { %1232 = shalt.err (!%p1229_p2)
}
   0x8   :  { %s1233_s26 = scalar_lea.vmem %s28_s18, 1024  ;;  %p1238_p4 = scmp.lt.s32.totalorder %s28_s18, %s28_s18 }
   0x9   :  { %p1234_p3 = scmp.ne.s32.totalorder %s28_s18, %s1233_s26  ;;  %p1239_p5 = scmp.lt.s32.totalorder %s1233_s26, %s1233_s26 }
   0xb   :  { %p1240_p6 = por %p1239_p5, %p1238_p4 }
   0xd   :  { %p1241_p7 = pnand %p1240_p6, %p1234_p3 }
   0xf   :  { %1244 = shalt.err (!%p1241_p7)
}
  0x10   :  { %s1272_s27 = smov 512   ;;  %s1273_s28 = smov 32  }
  0x11   :  { %33 = dma.hbm_to_vmem [thread:$0]  %s1791_s2, 1024, %s28_s18, [#allocation3], %s1272_s27, %s1272_s27, %s1273_s28  }
  0x12   :  { %s1274_s12 = smov [#allocation4]   ;;  %s1245_s16 = scalar_lea.hbm %s1796_s7, 8192 }
  0x13   :  { %s47_s13 = sshll.u32 %s1274_s12, 4  ;;  %p1246_p8 = scmp.ne.s32.totalorder %s1796_s7, %s1245_s16  ;;  %s48_s13 = int_to_ptr.vmem [resolvable:$true] %s47_s13 }
  0x14   :  { %p1249_p9 = scmp.lt.u32.totalorder %s1245_s16, %s1796_s7 }
  0x16   :  { %p1251_p10 = pnand %p1249_p9, %p1246_p8 }
  0x18   :  { %1254 = shalt.err (!%p1251_p10)
}
  0x19   :  { %s1255_s22 = scalar_lea.vmem %s48_s13, 8192  ;;  %p1260_p12 = scmp.lt.s32.totalorder %s48_s13, %s48_s13 }
  0x1a   :  { %p1256_p11 = scmp.ne.s32.totalorder %s48_s13, %s1255_s22  ;;  %p1261_p13 = scmp.lt.s32.totalorder %s1255_s22, %s1255_s22 }
  0x1c   :  { %p1262_p0 = por %p1261_p13, %p1260_p12 }
  0x1e   :  { %p1263_p1 = pnand %p1262_p0, %p1256_p11 }
  0x20   :  { %1266 = shalt.err (!%p1263_p1)
}
  0x21   :  { %s1275_s2 = smov 256   ;;  %s1276_s18 = smov 16  }
  0x22   :  { %53 = dma.hbm_to_vmem [thread:$0]  %s1796_s7, 8192, %s48_s13, [#allocation5], %s1275_s2, %s1275_s2, %s1276_s18  }
  0x23   :  { %1267 = dma.done.wait [#allocation3], 1024  }
  0x24   :  { %1268 = vsyncadd [#allocation3], 4294966272 }
  0x25   :  { %1269 = dma.done.wait [#allocation5], 8192  }
  0x26   :  { %1270 = vsyncadd [#allocation5], 4294959104  ;;  %v1277_v0 = vmov 0.0   ;;  %v76_v1 = vld [vmem:[%s1792_s3] sm:$0xff]  ;;  %vm86_vm0 = vcmask 1043456   ;;  %v77_v2 = vld [vmem:[%s1792_s3 + $0x8] sm:$0xff] }
  0x27   :  { %159 = vmatprep.mubr.f32.mxu0 %v1277_v0  ;;  %230 = vmatprep.mubr.f32.mxu1 %v1277_v0  ;;  %v75_v3 = vld [vmem:[%s1790_s1] sm:$0xff]  ;;  %v80_v4 = vcombine.high %v76_v1, %v76_v1  ;;  %v81_v5 = vcombine.high %v77_v2, %v77_v2  ;;  %v68_v6 = vld [vmem:[#allocation2 + $0x8] sm:$0xff]  ;;  %v70_v8 = vld [vmem:[#allocation2 + $0x18] sm:$0xff]  ;;  %vm82_vm1 = vcmask 31744   ;;  %vm237_vm2 = vcmask 130048  }
  0x28   :  { %v72_v7 = vld [vmem:[#allocation2 + $0x28] sm:$0xff]  ;;  %v74_v10 = vld [vmem:[#allocation2 + $0x38] sm:$0xff]  ;;  %v67_v11 = vld [vmem:[#allocation2] sm:$0xff]  ;;  %vm923_vm3 = vcmask 15360  }
  0x29   :  { %v1010_v9 = vpack.c.bf16 %v72_v7, %v68_v6  ;;  %v71_v12 = vld [vmem:[#allocation2 + $0x20] sm:$0xff]  ;;  %931 = vmatprep.subr.msk.mxu0 %vm86_vm0, %v80_v4  ;;  %934 = vmatprep.subr.msk.mxu1 %vm86_vm0, %v81_v5  ;;  %v1014_v13 = vpack.c.bf16 %v74_v10, %v70_v8  ;;  %v69_v15 = vld [vmem:[#allocation2 + $0x10] sm:$0xff]  ;;  %v414_v18 = vld [vmem:[%s1794_s5 + $0x8] sm:$0xff] }
  0x2a   :  { %v1012_v14 = vpack.c.bf16 %v71_v12, %v67_v11  ;;  %v73_v16 = vld [vmem:[#allocation2 + $0x30] sm:$0xff]  ;;  %932 = vmatpush1.msk.msra.mxu0 %vm86_vm0, %v76_v1  ;;  %935 = vmatpush1.msk.msra.mxu1 %vm86_vm0, %v77_v2  ;;  %v416_v19 = vld [vmem:[%s1794_s5 + $0x18] sm:$0xff]  ;;  %v563_v20 = vld [vmem:[#allocation4 + $0x8] sm:$0xff] }
  0x2b   :  { %v1016_v17 = vpack.c.bf16 %v73_v16, %v69_v15  ;;  %933 = vmatmul.mubr.msk.f32.vlgmr.msra.gmra.mrb[0].mxu0 %vm82_vm1, %v75_v3  ;;  %936 = vmatmul.mubr.msk.f32.vlgmr.msra.gmra.mrb[0].mxu1 %vm82_vm1, %v75_v3  ;;  %v1018_v21 = vpack.c.bf16 %v416_v19, %v414_v18  ;;  %v565_v22 = vld [vmem:[#allocation4 + $0x18] sm:$0xff]  ;;  %v413_v24 = vld [vmem:[%s1794_s5] sm:$0xff]  ;;  %v415_v25 = vld [vmem:[%s1794_s5 + $0x10] sm:$0xff] }
  0x2c   :  { %1011 = vmatprep.subr.bf16.mxu0 %v1010_v9  ;;  %1015 = vmatprep.subr.bf16.mxu1 %v1014_v13  ;;  %v1082_v23 = vpack.c.bf16 %v565_v22, %v563_v20  ;;  %v562_v26 = vld [vmem:[#allocation4] sm:$0xff]  ;;  %v564_v27 = vld [vmem:[#allocation4 + $0x10] sm:$0xff]  ;;  %v418_v28 = vld [vmem:[%s1794_s5 + $0x28] sm:$0xff]  ;;  %v1020_v33 = vpack.c.bf16 %v415_v25, %v413_v24 }
  0x2d   :  { %1013 = vmatpush1.bf16.msra.mxu0 %v1012_v14  ;;  %1017 = vmatpush1.bf16.msra.mxu1 %v1016_v17  ;;  %v420_v29 = vld [vmem:[%s1794_s5 + $0x38] sm:$0xff]  ;;  %v567_v30 = vld [vmem:[#allocation4 + $0x28] sm:$0xff]  ;;  %v66_v32 = vld [vmem:[%s1789_s0] sm:$0xff]  ;;  %v1084_v34 = vpack.c.bf16 %v564_v27, %v562_v26 }
  0x2e   :  { %305 = vmatprep.mubr.f32.mxu0 %v1277_v0  ;;  %376 = vmatprep.mubr.f32.mxu1 %v1277_v0  ;;  %v569_v31 = vld [vmem:[#allocation4 + $0x38] sm:$0xff]  ;;  %v417_v35 = vld [vmem:[%s1794_s5 + $0x20] sm:$0xff]  ;;  %v419_v36 = vld [vmem:[%s1794_s5 + $0x30] sm:$0xff]  ;;  %v1022_v37 = vpack.c.bf16 %v420_v29, %v418_v28 }
  0x2f   :  { %1019 = vmatprep.subr.bf16.mxu0 %v1018_v21  ;;  %1083 = vmatprep.subr.bf16.mxu1 %v1082_v23  ;;  %v1086_v38 = vpack.c.bf16 %v569_v31, %v567_v30  ;;  %v566_v39 = vld [vmem:[#allocation4 + $0x20] sm:$0xff]  ;;  %v568_v40 = vld [vmem:[#allocation4 + $0x30] sm:$0xff]  ;;  %v422_v41 = vld [vmem:[%s1794_s5 + $0x48] sm:$0xff]  ;;  %v1024_v45 = vpack.c.bf16 %v419_v36, %v417_v35 }
  0x30   :  { %v424_v42 = vld [vmem:[%s1794_s5 + $0x58] sm:$0xff]  ;;  %v571_v43 = vld [vmem:[#allocation4 + $0x48] sm:$0xff]  ;;  %v1088_v46 = vpack.c.bf16 %v568_v40, %v566_v39  ;;  %v421_v47 = vld [vmem:[%s1794_s5 + $0x40] sm:$0xff] }
  0x31   :  { %v573_v44 = vld [vmem:[#allocation4 + $0x58] sm:$0xff]  ;;  %v423_v48 = vld [vmem:[%s1794_s5 + $0x50] sm:$0xff]  ;;  %v1026_v49 = vpack.c.bf16 %v424_v42, %v422_v41  ;;  %v570_v51 = vld [vmem:[#allocation4 + $0x40] sm:$0xff] }
  0x32   :  { %v1090_v50 = vpack.c.bf16 %v573_v44, %v571_v43  ;;  %v572_v52 = vld [vmem:[#allocation4 + $0x50] sm:$0xff]  ;;  %v426_v53 = vld [vmem:[%s1794_s5 + $0x68] sm:$0xff]  ;;  %v428_v54 = vld [vmem:[%s1794_s5 + $0x78] sm:$0xff]  ;;  %v1028_v57 = vpack.c.bf16 %v423_v48, %v421_v47 }
  0x33   :  { %937 = vmatmul.mubr.msk.f32.vlgmr.msra.gmra.mrb[0].mxu0 %vm237_vm2, %v66_v32  ;;  %938 = vmatmul.mubr.msk.f32.vlgmr.msra.gmra.mrb[0].mxu1 %vm237_vm2, %v66_v32  ;;  %v575_v55 = vld [vmem:[#allocation4 + $0x68] sm:$0xff]  ;;  %v577_v56 = vld [vmem:[#allocation4 + $0x78] sm:$0xff]  ;;  %v1092_v58 = vpack.c.bf16 %v572_v52, %v570_v51  ;;  %v425_v59 = vld [vmem:[%s1794_s5 + $0x60] sm:$0xff]  ;;  %v1030_v61 = vpack.c.bf16 %v428_v54, %v426_v53 }
  0x34   :  { %1021 = vmatpush1.bf16.msra.mxu0 %v1020_v33  ;;  %1085 = vmatpush1.bf16.msra.mxu1 %v1084_v34  ;;  %v427_v60 = vld [vmem:[%s1794_s5 + $0x70] sm:$0xff]  ;;  %v1094_v62 = vpack.c.bf16 %v577_v56, %v575_v55  ;;  %v574_v63 = vld [vmem:[#allocation4 + $0x60] sm:$0xff]  ;;  %v430_v1 = vld [vmem:[%s1794_s5 + $0x88] sm:$0xff] }
  0x35   :  { %1023 = vmatprep.subr.bf16.mxu0 %v1022_v37  ;;  %1087 = vmatprep.subr.bf16.mxu1 %v1086_v38  ;;  %v576_v0 = vld [vmem:[#allocation4 + $0x70] sm:$0xff]  ;;  %v432_v2 = vld [vmem:[%s1794_s5 + $0x98] sm:$0xff]  ;;  %v579_v3 = vld [vmem:[#allocation4 + $0x88] sm:$0xff]  ;;  %v1032_v5 = vpack.c.bf16 %v427_v60, %v425_v59 }
  0x36   :  { %v581_v4 = vld [vmem:[#allocation4 + $0x98] sm:$0xff]  ;;  %v1096_v6 = vpack.c.bf16 %v576_v0, %v574_v63  ;;  %v429_v7 = vld [vmem:[%s1794_s5 + $0x80] sm:$0xff]  ;;  %v431_v8 = vld [vmem:[%s1794_s5 + $0x90] sm:$0xff]  ;;  %v1034_v9 = vpack.c.bf16 %v432_v2, %v430_v1 }
  0x37   :  { %v1098_v10 = vpack.c.bf16 %v581_v4, %v579_v3  ;;  %v578_v11 = vld [vmem:[#allocation4 + $0x80] sm:$0xff]  ;;  %v580_v12 = vld [vmem:[#allocation4 + $0x90] sm:$0xff]  ;;  %v434_v13 = vld [vmem:[%s1794_s5 + $0xa8] sm:$0xff]  ;;  %v1036_v17 = vpack.c.bf16 %v431_v8, %v429_v7 }
  0x38   :  { %1025 = vmatpush1.bf16.msra.mxu0 %v1024_v45  ;;  %1089 = vmatpush1.bf16.msra.mxu1 %v1088_v46  ;;  %v436_v14 = vld [vmem:[%s1794_s5 + $0xb8] sm:$0xff]  ;;  %v583_v15 = vld [vmem:[#allocation4 + $0xa8] sm:$0xff]  ;;  %v1100_v18 = vpack.c.bf16 %v580_v12, %v578_v11  ;;  %v433_v19 = vld [vmem:[%s1794_s5 + $0xa0] sm:$0xff] }
  0x39   :  { %1027 = vmatprep.subr.bf16.mxu0 %v1026_v49  ;;  %1091 = vmatprep.subr.bf16.mxu1 %v1090_v50  ;;  %v585_v16 = vld [vmem:[#allocation4 + $0xb8] sm:$0xff]  ;;  %v435_v20 = vld [vmem:[%s1794_s5 + $0xb0] sm:$0xff]  ;;  %v1038_v21 = vpack.c.bf16 %v436_v14, %v434_v13  ;;  %v582_v23 = vld [vmem:[#allocation4 + $0xa0] sm:$0xff] }
  0x3a   :  { %v1102_v22 = vpack.c.bf16 %v585_v16, %v583_v15  ;;  %v584_v24 = vld [vmem:[#allocation4 + $0xb0] sm:$0xff]  ;;  %v438_v25 = vld [vmem:[%s1794_s5 + $0xc8] sm:$0xff]  ;;  %v440_v26 = vld [vmem:[%s1794_s5 + $0xd8] sm:$0xff]  ;;  %v1040_v29 = vpack.c.bf16 %v435_v20, %v433_v19 }
  0x3b   :  { %v587_v27 = vld [vmem:[#allocation4 + $0xc8] sm:$0xff]  ;;  %v589_v28 = vld [vmem:[#allocation4 + $0xd8] sm:$0xff]  ;;  %v1104_v30 = vpack.c.bf16 %v584_v24, %v582_v23  ;;  %v437_v31 = vld [vmem:[%s1794_s5 + $0xc0] sm:$0xff]  ;;  %v1042_v33 = vpack.c.bf16 %v440_v26, %v438_v25 }
  0x3c   :  { %1029 = vmatpush1.bf16.msra.mxu0 %v1028_v57  ;;  %1093 = vmatpush1.bf16.msra.mxu1 %v1092_v58  ;;  %v439_v32 = vld [vmem:[%s1794_s5 + $0xd0] sm:$0xff]  ;;  %v1106_v34 = vpack.c.bf16 %v589_v28, %v587_v27  ;;  %v586_v35 = vld [vmem:[#allocation4 + $0xc0] sm:$0xff]  ;;  %v442_v37 = vld [vmem:[%s1794_s5 + $0xe8] sm:$0xff] }
  0x3d   :  { %1031 = vmatprep.subr.bf16.mxu0 %v1030_v61  ;;  %1095 = vmatprep.subr.bf16.mxu1 %v1094_v62  ;;  %v588_v36 = vld [vmem:[#allocation4 + $0xd0] sm:$0xff]  ;;  %v444_v38 = vld [vmem:[%s1794_s5 + $0xf8] sm:$0xff]  ;;  %v591_v39 = vld [vmem:[#allocation4 + $0xe8] sm:$0xff]  ;;  %v1044_v41 = vpack.c.bf16 %v439_v32, %v437_v31 }
  0x3e   :  { %v593_v40 = vld [vmem:[#allocation4 + $0xf8] sm:$0xff]  ;;  %v1108_v42 = vpack.c.bf16 %v588_v36, %v586_v35  ;;  %v441_v43 = vld [vmem:[%s1794_s5 + $0xe0] sm:$0xff]  ;;  %v443_v44 = vld [vmem:[%s1794_s5 + $0xf0] sm:$0xff]  ;;  %v1046_v45 = vpack.c.bf16 %v444_v38, %v442_v37 }
  0x3f   :  { %v1110_v46 = vpack.c.bf16 %v593_v40, %v591_v39  ;;  %v590_v47 = vld [vmem:[#allocation4 + $0xe0] sm:$0xff]  ;;  %v592_v48 = vld [vmem:[#allocation4 + $0xf0] sm:$0xff]  ;;  %v446_v49 = vld [vmem:[%s1794_s5 + $0x108] sm:$0xff]  ;;  %v1048_v53 = vpack.c.bf16 %v443_v44, %v441_v43 }
  0x40   :  { %1033 = vmatpush1.bf16.msra.mxu0 %v1032_v5  ;;  %1097 = vmatpush1.bf16.msra.mxu1 %v1096_v6  ;;  %v448_v50 = vld [vmem:[%s1794_s5 + $0x118] sm:$0xff]  ;;  %v595_v51 = vld [vmem:[#allocation4 + $0x108] sm:$0xff]  ;;  %v1112_v54 = vpack.c.bf16 %v592_v48, %v590_v47  ;;  %v445_v55 = vld [vmem:[%s1794_s5 + $0x100] sm:$0xff] }
  0x41   :  { %1035 = vmatprep.subr.bf16.mxu0 %v1034_v9  ;;  %1099 = vmatprep.subr.bf16.mxu1 %v1098_v10  ;;  %v597_v52 = vld [vmem:[#allocation4 + $0x118] sm:$0xff]  ;;  %v447_v56 = vld [vmem:[%s1794_s5 + $0x110] sm:$0xff]  ;;  %v1050_v57 = vpack.c.bf16 %v448_v50, %v446_v49  ;;  %v594_v59 = vld [vmem:[#allocation4 + $0x100] sm:$0xff] }
  0x42   :  { %v1114_v58 = vpack.c.bf16 %v597_v52, %v595_v51  ;;  %v596_v60 = vld [vmem:[#allocation4 + $0x110] sm:$0xff]  ;;  %v450_v61 = vld [vmem:[%s1794_s5 + $0x128] sm:$0xff]  ;;  %v452_v62 = vld [vmem:[%s1794_s5 + $0x138] sm:$0xff]  ;;  %v1052_v1 = vpack.c.bf16 %v447_v56, %v445_v55 }
  0x43   :  { %v599_v63 = vld [vmem:[#allocation4 + $0x128] sm:$0xff]  ;;  %v601_v0 = vld [vmem:[#allocation4 + $0x138] sm:$0xff]  ;;  %v1116_v2 = vpack.c.bf16 %v596_v60, %v594_v59  ;;  %v449_v3 = vld [vmem:[%s1794_s5 + $0x120] sm:$0xff]  ;;  %v1054_v5 = vpack.c.bf16 %v452_v62, %v450_v61 }
  0x44   :  { %1037 = vmatpush1.bf16.msra.mxu0 %v1036_v17  ;;  %1101 = vmatpush1.bf16.msra.mxu1 %v1100_v18  ;;  %v451_v4 = vld [vmem:[%s1794_s5 + $0x130] sm:$0xff]  ;;  %v1118_v6 = vpack.c.bf16 %v601_v0, %v599_v63  ;;  %v598_v7 = vld [vmem:[#allocation4 + $0x120] sm:$0xff]  ;;  %v454_v9 = vld [vmem:[%s1794_s5 + $0x148] sm:$0xff] }
  0x45   :  { %1039 = vmatprep.subr.bf16.mxu0 %v1038_v21  ;;  %1103 = vmatprep.subr.bf16.mxu1 %v1102_v22  ;;  %v600_v8 = vld [vmem:[#allocation4 + $0x130] sm:$0xff]  ;;  %v456_v10 = vld [vmem:[%s1794_s5 + $0x158] sm:$0xff]  ;;  %v603_v11 = vld [vmem:[#allocation4 + $0x148] sm:$0xff]  ;;  %v1056_v13 = vpack.c.bf16 %v451_v4, %v449_v3 }
  0x46   :  { %v605_v12 = vld [vmem:[#allocation4 + $0x158] sm:$0xff]  ;;  %v1120_v14 = vpack.c.bf16 %v600_v8, %v598_v7  ;;  %v453_v15 = vld [vmem:[%s1794_s5 + $0x140] sm:$0xff]  ;;  %v455_v16 = vld [vmem:[%s1794_s5 + $0x150] sm:$0xff]  ;;  %v1058_v17 = vpack.c.bf16 %v456_v10, %v454_v9 }
  0x47   :  { %v1122_v18 = vpack.c.bf16 %v605_v12, %v603_v11  ;;  %v602_v19 = vld [vmem:[#allocation4 + $0x140] sm:$0xff]  ;;  %v604_v20 = vld [vmem:[#allocation4 + $0x150] sm:$0xff]  ;;  %v458_v21 = vld [vmem:[%s1794_s5 + $0x168] sm:$0xff]  ;;  %v1060_v25 = vpack.c.bf16 %v455_v16, %v453_v15 }
  0x48   :  { %1041 = vmatpush1.bf16.msra.mxu0 %v1040_v29  ;;  %1105 = vmatpush1.bf16.msra.mxu1 %v1104_v30  ;;  %v460_v22 = vld [vmem:[%s1794_s5 + $0x178] sm:$0xff]  ;;  %v607_v23 = vld [vmem:[#allocation4 + $0x168] sm:$0xff]  ;;  %v1124_v26 = vpack.c.bf16 %v604_v20, %v602_v19  ;;  %v457_v27 = vld [vmem:[%s1794_s5 + $0x160] sm:$0xff] }
  0x49   :  { %1043 = vmatprep.subr.bf16.mxu0 %v1042_v33  ;;  %1107 = vmatprep.subr.bf16.mxu1 %v1106_v34  ;;  %v609_v24 = vld [vmem:[#allocation4 + $0x178] sm:$0xff]  ;;  %v459_v28 = vld [vmem:[%s1794_s5 + $0x170] sm:$0xff]  ;;  %v1062_v29 = vpack.c.bf16 %v460_v22, %v458_v21  ;;  %v606_v31 = vld [vmem:[#allocation4 + $0x160] sm:$0xff] }
  0x4a   :  { %v1126_v30 = vpack.c.bf16 %v609_v24, %v607_v23  ;;  %v608_v32 = vld [vmem:[#allocation4 + $0x170] sm:$0xff]  ;;  %v462_v33 = vld [vmem:[%s1794_s5 + $0x188] sm:$0xff]  ;;  %v464_v34 = vld [vmem:[%s1794_s5 + $0x198] sm:$0xff]  ;;  %v1064_v37 = vpack.c.bf16 %v459_v28, %v457_v27 }
  0x4b   :  { %v611_v35 = vld [vmem:[#allocation4 + $0x188] sm:$0xff]  ;;  %v613_v36 = vld [vmem:[#allocation4 + $0x198] sm:$0xff]  ;;  %v1128_v38 = vpack.c.bf16 %v608_v32, %v606_v31  ;;  %v461_v39 = vld [vmem:[%s1794_s5 + $0x180] sm:$0xff] }
  0x4c   :  { %1045 = vmatpush1.bf16.msra.mxu0 %v1044_v41  ;;  %1109 = vmatpush1.bf16.msra.mxu1 %v1108_v42  ;;  %v463_v40 = vld [vmem:[%s1794_s5 + $0x190] sm:$0xff]  ;;  %v1066_v41 = vpack.c.bf16 %v464_v34, %v462_v33  ;;  %v1130_v42 = vpack.c.bf16 %v613_v36, %v611_v35  ;;  %v610_v43 = vld [vmem:[#allocation4 + $0x180] sm:$0xff]  ;;  %v615_v47 = vld [vmem:[#allocation4 + $0x1a8] sm:$0xff] }
  0x4d   :  { %1047 = vmatprep.subr.bf16.mxu0 %v1046_v45  ;;  %1111 = vmatprep.subr.bf16.mxu1 %v1110_v46  ;;  %v612_v44 = vld [vmem:[#allocation4 + $0x190] sm:$0xff]  ;;  %v466_v45 = vld [vmem:[%s1794_s5 + $0x1a8] sm:$0xff]  ;;  %v468_v46 = vld [vmem:[%s1794_s5 + $0x1b8] sm:$0xff]  ;;  %v1068_v49 = vpack.c.bf16 %v463_v40, %v461_v39 }
  0x4e   :  { %v617_v48 = vld [vmem:[#allocation4 + $0x1b8] sm:$0xff]  ;;  %v1132_v50 = vpack.c.bf16 %v612_v44, %v610_v43  ;;  %v465_v51 = vld [vmem:[%s1794_s5 + $0x1a0] sm:$0xff]  ;;  %v467_v52 = vld [vmem:[%s1794_s5 + $0x1b0] sm:$0xff] }
  0x4f   :  { %v614_v55 = vld [vmem:[#allocation4 + $0x1a0] sm:$0xff]  ;;  %v616_v56 = vld [vmem:[#allocation4 + $0x1b0] sm:$0xff]  ;;  %v619_v59 = vld [vmem:[#allocation4 + $0x1c8] sm:$0xff]  ;;  %v1072_v61 = vpack.c.bf16 %v467_v52, %v465_v51 }
  0x50   :  { %1049 = vmatpush1.bf16.msra.mxu0 %v1048_v53  ;;  %1113 = vmatpush1.bf16.msra.mxu1 %v1112_v54  ;;  %v1070_v53 = vpack.c.bf16 %v468_v46, %v466_v45  ;;  %v1134_v54 = vpack.c.bf16 %v617_v48, %v615_v47  ;;  %v621_v60 = vld [vmem:[#allocation4 + $0x1d8] sm:$0xff]  ;;  %v1136_v62 = vpack.c.bf16 %v616_v56, %v614_v55  ;;  %v618_v3 = vld [vmem:[#allocation4 + $0x1c0] sm:$0xff]  ;;  %v474_v7 = vld [vmem:[%s1794_s5 + $0x1e8] sm:$0xff] }
  0x51   :  { %1051 = vmatprep.subr.bf16.mxu0 %v1050_v57  ;;  %1115 = vmatprep.subr.bf16.mxu1 %v1114_v58  ;;  %v470_v57 = vld [vmem:[%s1794_s5 + $0x1c8] sm:$0xff]  ;;  %v472_v58 = vld [vmem:[%s1794_s5 + $0x1d8] sm:$0xff]  ;;  %v1138_v0 = vpack.c.bf16 %v621_v60, %v619_v59  ;;  %v473_v12 = vld [vmem:[%s1794_s5 + $0x1e0] sm:$0xff] }
  0x52   :  { %v1074_v63 = vpack.c.bf16 %v472_v58, %v470_v57  ;;  %v476_v8 = vld [vmem:[%s1794_s5 + $0x1f8] sm:$0xff]  ;;  %v623_v9 = vld [vmem:[#allocation4 + $0x1e8] sm:$0xff]  ;;  %v622_v16 = vld [vmem:[#allocation4 + $0x1e0] sm:$0xff] }
  0x53   :  { %v1078_v10 = vpack.c.bf16 %v476_v8, %v474_v7  ;;  %v625_v11 = vld [vmem:[#allocation4 + $0x1f8] sm:$0xff]  ;;  %v759_v19 = vld [vmem:[%s1798_s9 + $0x180] sm:$0xff]  ;;  %v760_v20 = vld [vmem:[%s1798_s9 + $0x188] sm:$0xff] }
  0x54   :  { %1053 = vmatpush1.bf16.msra.mxu0 %v1052_v1  ;;  %1117 = vmatpush1.bf16.msra.mxu1 %v1116_v2  ;;  %v469_v1 = vld [vmem:[%s1794_s5 + $0x1c0] sm:$0xff]  ;;  %v471_v2 = vld [vmem:[%s1794_s5 + $0x1d0] sm:$0xff]  ;;  %v1146_v22 = vpack.c.bf16 %v760_v20, %v759_v19  ;;  %v728_v23 = vld [vmem:[%s1798_s9 + $0x88] sm:$0xff] }
  0x55   :  { %1055 = vmatprep.subr.bf16.mxu0 %v1054_v5  ;;  %1119 = vmatprep.subr.bf16.mxu1 %v1118_v6  ;;  %v1076_v4 = vpack.c.bf16 %v471_v2, %v469_v1  ;;  %v620_v5 = vld [vmem:[#allocation4 + $0x1d0] sm:$0xff]  ;;  %v727_v21 = vld [vmem:[%s1798_s9 + $0x80] sm:$0xff]  ;;  %v744_v39 = vld [vmem:[%s1798_s9 + $0x108] sm:$0xff] }
  0x56   :  { %v1140_v6 = vpack.c.bf16 %v620_v5, %v618_v3  ;;  %v1178_v24 = vpack.c.bf16 %v728_v23, %v727_v21  ;;  %v711_v44 = vld [vmem:[%s1798_s9] sm:$0xff]  ;;  %v712_v45 = vld [vmem:[%s1798_s9 + $0x8] sm:$0xff]  ;;  %v761_v46 = vld [vmem:[%s1798_s9 + $0x190] sm:$0xff] }
  0x57   :  { %v730_v51 = vld [vmem:[%s1798_s9 + $0x98] sm:$0xff]  ;;  %v1180_v55 = vpack.c.bf16 %v712_v45, %v711_v44  ;;  %v745_v56 = vld [vmem:[%s1798_s9 + $0x110] sm:$0xff]  ;;  %v764_v1 = vld [vmem:[%s1798_s9 + $0x1a8] sm:$0xff] }
  0x58   :  { %1057 = vmatpush1.bf16.msra.mxu0 %v1056_v13  ;;  %1121 = vmatpush1.bf16.msra.mxu1 %v1120_v14  ;;  %v475_v13 = vld [vmem:[%s1794_s5 + $0x1f0] sm:$0xff]  ;;  %v1142_v14 = vpack.c.bf16 %v625_v11, %v623_v9  ;;  %v746_v57 = vld [vmem:[%s1798_s9 + $0x118] sm:$0xff]  ;;  %v731_v2 = vld [vmem:[%s1798_s9 + $0xa0] sm:$0xff] }
  0x59   :  { %1059 = vmatprep.subr.bf16.mxu0 %v1058_v17  ;;  %1123 = vmatprep.subr.bf16.mxu1 %v1122_v18  ;;  %v1080_v15 = vpack.c.bf16 %v475_v13, %v473_v12  ;;  %v624_v17 = vld [vmem:[#allocation4 + $0x1f0] sm:$0xff]  ;;  %v732_v3 = vld [vmem:[%s1798_s9 + $0xa8] sm:$0xff]  ;;  %v766_v13 = vld [vmem:[%s1798_s9 + $0x1b8] sm:$0xff] }
  0x5a   :  { %v1144_v18 = vpack.c.bf16 %v624_v17, %v622_v16  ;;  %v748_v7 = vld [vmem:[%s1798_s9 + $0x128] sm:$0xff]  ;;  %v1186_v9 = vpack.c.bf16 %v732_v3, %v731_v2  ;;  %v765_v12 = vld [vmem:[%s1798_s9 + $0x1b0] sm:$0xff]  ;;  %v750_v19 = vld [vmem:[%s1798_s9 + $0x138] sm:$0xff] }
  0x5b   :  { %v716_v11 = vld [vmem:[%s1798_s9 + $0x28] sm:$0xff]  ;;  %v1158_v20 = vpack.c.bf16 %v766_v13, %v765_v12  ;;  %v718_v23 = vld [vmem:[%s1798_s9 + $0x38] sm:$0xff]  ;;  %v753_v44 = vld [vmem:[%s1798_s9 + $0x150] sm:$0xff] }
  0x5c   :  { %1061 = vmatpush1.bf16.msra.mxu0 %v1060_v25  ;;  %1125 = vmatpush1.bf16.msra.mxu1 %v1124_v26  ;;  %v385_v25 = vlaneseq  ;;  %v754_v45 = vld [vmem:[%s1798_s9 + $0x158] sm:$0xff]  ;;  %v741_v2 = vld [vmem:[%s1798_s9 + $0xf0] sm:$0xff]  ;;  %v477_v12 = vld [vmem:[%s1795_s6] sm:$0x3] }
  0x5d   :  { %1063 = vmatprep.subr.bf16.mxu0 %v1062_v29  ;;  %1127 = vmatprep.subr.bf16.mxu1 %v1126_v30  ;;  %v383_v29 = vld [vmem:[%s1793_s4] sm:$0xf] }
  0x5e   :  { %v386_v26 = vshrl.u32 %v385_v25, 7  ;;  %v768_v25 = vld [vmem:[%s1798_s9 + $0x1c8] sm:$0xff]  ;;  %v626_v13 = vld [vmem:[%s1797_s8] sm:$0x3] }
  0x60   :  { %1065 = vmatpush1.bf16.msra.mxu0 %v1064_v37  ;;  %1129 = vmatpush1.bf16.msra.mxu1 %v1128_v38  ;;  %v1584_v27 = vsub.s32 0, %v386_v26  ;;  %v395_v28 = vsub.s32 2, %v386_v26  ;;  %v1589_v30 = vsub.s32 1, %v386_v26  ;;  %v399_v31 = vsub.s32 3, %v386_v26  ;;  %v743_v38 = vld [vmem:[%s1798_s9 + $0x100] sm:$0xff] }
  0x61   :  { %1067 = vmatprep.subr.bf16.mxu0 %v1066_v41  ;;  %1131 = vmatprep.subr.bf16.mxu1 %v1130_v42  ;;  %v735_v26 = vld [vmem:[%s1798_s9 + $0xc0] sm:$0xff] }
  0x62   :  { %v388_v32 = vrot.slane %v383_v29, %v1584_v27  ;;  %v396_v33 = vrot.slane %v383_v29, %v395_v28  ;;  %v392_v34 = vrot.slane %v383_v29, %v1589_v30  ;;  %v400_v35 = vrot.slane %v383_v29, %v399_v31  ;;  %v736_v28 = vld [vmem:[%s1798_s9 + $0xc8] sm:$0xff] }
  0x64   :  { %1069 = vmatpush1.bf16.msra.mxu0 %v1068_v49  ;;  %1133 = vmatpush1.bf16.msra.mxu1 %v1132_v50  ;;  %v762_v49 = vld [vmem:[%s1798_s9 + $0x198] sm:$0xff]  ;;  %v729_v50 = vld [vmem:[%s1798_s9 + $0x90] sm:$0xff] }
  0x65   :  { %1071 = vmatprep.subr.bf16.mxu0 %v1070_v53  ;;  %1135 = vmatprep.subr.bf16.mxu1 %v1134_v54  ;;  %v1148_v54 = vpack.c.bf16 %v744_v39, %v743_v38  ;;  %v1150_v60 = vpack.c.bf16 %v762_v49, %v761_v46  ;;  %v769_v38 = vld [vmem:[%s1798_s9 + $0x1d0] sm:$0xff]  ;;  %v770_v39 = vld [vmem:[%s1798_s9 + $0x1d8] sm:$0xff] }
  0x66   :  { %v1166_v46 = vpack.c.bf16 %v770_v39, %v769_v38  ;;  %v722_v49 = vld [vmem:[%s1798_s9 + $0x58] sm:$0xff] }
  0x68   :  { %1073 = vmatpush1.bf16.msra.mxu0 %v1072_v61  ;;  %1137 = vmatpush1.bf16.msra.mxu1 %v1136_v62  ;;  %v1182_v61 = vpack.c.bf16 %v730_v51, %v729_v50  ;;  %v713_v62 = vld [vmem:[%s1798_s9 + $0x10] sm:$0xff]  ;;  %v771_v50 = vld [vmem:[%s1798_s9 + $0x1e0] sm:$0xff]  ;;  %v772_v51 = vld [vmem:[%s1798_s9 + $0x1e8] sm:$0xff] }
  0x69   :  { %1075 = vmatprep.subr.bf16.mxu0 %v1074_v63  ;;  %1139 = vmatprep.subr.bf16.mxu1 %v1138_v0  ;;  %v714_v63 = vld [vmem:[%s1798_s9 + $0x18] sm:$0xff]  ;;  %v763_v0 = vld [vmem:[%s1798_s9 + $0x1a0] sm:$0xff] }
  0x6a   :  { %v1184_v5 = vpack.c.bf16 %v714_v63, %v713_v62  ;;  %v1154_v8 = vpack.c.bf16 %v764_v1, %v763_v0  ;;  %v724_v62 = vld [vmem:[%s1798_s9 + $0x68] sm:$0xff]  ;;  %v773_v0 = vld [vmem:[%s1798_s9 + $0x1f0] sm:$0xff]  ;;  %v774_v1 = vld [vmem:[%s1798_s9 + $0x1f8] sm:$0xff] }
  0x6b   :  { %v1174_v3 = vpack.c.bf16 %v774_v1, %v773_v0 }
  0x6c   :  { %1077 = vmatpush1.bf16.msra.mxu0 %v1076_v4  ;;  %1141 = vmatpush1.bf16.msra.mxu1 %v1140_v6  ;;  %v1152_v4 = vpack.c.bf16 %v746_v57, %v745_v56  ;;  %v747_v6 = vld [vmem:[%s1798_s9 + $0x120] sm:$0xff]  ;;  %v1170_v56 = vpack.c.bf16 %v772_v51, %v771_v50 }
  0x6d   :  { %1079 = vmatprep.subr.bf16.mxu0 %v1078_v10  ;;  %1143 = vmatprep.subr.bf16.mxu1 %v1142_v14  ;;  %v715_v10 = vld [vmem:[%s1798_s9 + $0x20] sm:$0xff]  ;;  %v733_v14 = vld [vmem:[%s1798_s9 + $0xb0] sm:$0xff]  ;;  %v1156_v16 = vpack.c.bf16 %v748_v7, %v747_v6  ;;  %v758_v6 = vld [vmem:[%s1798_s9 + $0x178] sm:$0xff] }
  0x6e   :  { %v1188_v17 = vpack.c.bf16 %v716_v11, %v715_v10  ;;  %v726_v10 = vld [vmem:[%s1798_s9 + $0x78] sm:$0xff] }
  0x70   :  { %1081 = vmatpush1.bf16.msra.mxu0 %v1080_v15  ;;  %1145 = vmatpush1.bf16.msra.mxu1 %v1144_v18  ;;  %v734_v15 = vld [vmem:[%s1798_s9 + $0xb8] sm:$0xff]  ;;  %v749_v18 = vld [vmem:[%s1798_s9 + $0x130] sm:$0xff] }
  0x71   :  { %1147 = vmatprep.subr.bf16.mxu0 %v1146_v22  ;;  %1179 = vmatprep.subr.bf16.mxu1 %v1178_v24  ;;  %v1190_v21 = vpack.c.bf16 %v734_v15, %v733_v14  ;;  %v717_v22 = vld [vmem:[%s1798_s9 + $0x30] sm:$0xff]  ;;  %v767_v24 = vld [vmem:[%s1798_s9 + $0x1c0] sm:$0xff]  ;;  %v1160_v29 = vpack.c.bf16 %v750_v19, %v749_v18  ;;  %v482_v14 = vrot.slane %v477_v12, %v1584_v27 }
  0x72   :  { %v1192_v31 = vpack.c.bf16 %v718_v23, %v717_v22  ;;  %v631_v15 = vrot.slane %v626_v13, %v1584_v27 }
 0x106   :  { %v307_v36 = vpop.f32.mrb[0].mxu0  ;;  %v378_v37 = vpop.f32.mrb[0].mxu1 }
 0x107   :  { %v405_v40 = vadd.f32 %v388_v32, %v307_v36  ;;  %v407_v41 = vadd.f32 %v396_v33, %v378_v37  ;;  %v309_v42 = vpop.f32.mrb[1].mxu0  ;;  %v380_v43 = vpop.f32.mrb[1].mxu1  ;;  %v751_v32 = vld [vmem:[%s1798_s9 + $0x140] sm:$0xff]  ;;  %v752_v33 = vld [vmem:[%s1798_s9 + $0x148] sm:$0xff] }
 0x108   :  { %v406_v47 = vadd.f32 %v392_v34, %v309_v42  ;;  %v408_v48 = vadd.f32 %v400_v35, %v380_v43  ;;  %v1162_v34 = vpack.c.bf16 %v768_v25, %v767_v24  ;;  %v1194_v35 = vpack.c.bf16 %v736_v28, %v735_v26  ;;  %v719_v36 = vld [vmem:[%s1798_s9 + $0x40] sm:$0xff]  ;;  %v720_v37 = vld [vmem:[%s1798_s9 + $0x48] sm:$0xff] }
 0x109   :  { %v409_v58 = vmax.f32 %v405_v40, 0.0  ;;  %v411_v59 = vmax.f32 %v407_v41, 0.0  ;;  %v737_v40 = vld [vmem:[%s1798_s9 + $0xd0] sm:$0xff]  ;;  %v738_v41 = vld [vmem:[%s1798_s9 + $0xd8] sm:$0xff]  ;;  %v1164_v42 = vpack.c.bf16 %v752_v33, %v751_v32  ;;  %v1196_v43 = vpack.c.bf16 %v720_v37, %v719_v36  ;;  %v939_v36 = vld [vmem:[%s1799_s10] ss:$0 sm:$0xff] }
 0x10a   :  { %v410_v52 = vmax.f32 %v406_v47, 0.0  ;;  %v412_v53 = vmax.f32 %v408_v48, 0.0  ;;  %v1198_v47 = vpack.c.bf16 %v738_v41, %v737_v40  ;;  %v721_v48 = vld [vmem:[%s1798_s9 + $0x50] sm:$0xff] }
 0x10c   :  { %553 = vmatprep.mubr.f32.mxu0 %v410_v52  ;;  %702 = vmatprep.mubr.f32.mxu1 %v412_v53  ;;  %v739_v52 = vld [vmem:[%s1798_s9 + $0xe0] sm:$0xff]  ;;  %v740_v53 = vld [vmem:[%s1798_s9 + $0xe8] sm:$0xff] }
 0x10d   :  { %554 = vmatmul.mubr.f32.vlgmr.msra.gmra.mrb[2].mxu0 %v409_v58  ;;  %703 = vmatmul.mubr.f32.vlgmr.msra.gmra.mrb[2].mxu1 %v411_v59  ;;  %v1202_v57 = vpack.c.bf16 %v740_v53, %v739_v52  ;;  %v755_v58 = vld [vmem:[%s1798_s9 + $0x160] sm:$0xff]  ;;  %v756_v59 = vld [vmem:[%s1798_s9 + $0x168] sm:$0xff] }
 0x10e   :  { %1149 = vmatpush3.bf16.msra.mxu0 %v1148_v54  ;;  %1181 = vmatpush3.bf16.msra.mxu1 %v1180_v55  ;;  %v1168_v54 = vpack.c.bf16 %v754_v45, %v753_v44  ;;  %v1200_v55 = vpack.c.bf16 %v722_v49, %v721_v48 }
 0x10f   :  { %1151 = vmatprep.subr.bf16.mxu0 %v1150_v60  ;;  %1183 = vmatprep.subr.bf16.mxu1 %v1182_v61  ;;  %v723_v60 = vld [vmem:[%s1798_s9 + $0x60] sm:$0xff]  ;;  %v1172_v61 = vpack.c.bf16 %v756_v59, %v755_v58 }
 0x110   :  { %v1204_v63 = vpack.c.bf16 %v724_v62, %v723_v60 }
 0x112   :  { %1153 = vmatpush3.bf16.msra.mxu0 %v1152_v4  ;;  %1185 = vmatpush3.bf16.msra.mxu1 %v1184_v5  ;;  %v742_v4 = vld [vmem:[%s1798_s9 + $0xf8] sm:$0xff]  ;;  %v757_v5 = vld [vmem:[%s1798_s9 + $0x170] sm:$0xff] }
 0x113   :  { %1155 = vmatprep.subr.bf16.mxu0 %v1154_v8  ;;  %1187 = vmatprep.subr.bf16.mxu1 %v1186_v9  ;;  %v1206_v7 = vpack.c.bf16 %v742_v4, %v741_v2  ;;  %v1176_v8 = vpack.c.bf16 %v758_v6, %v757_v5  ;;  %v725_v9 = vld [vmem:[%s1798_s9 + $0x70] sm:$0xff] }
 0x114   :  { %v1208_v11 = vpack.c.bf16 %v726_v10, %v725_v9 }
 0x116   :  { %1157 = vmatpush3.bf16.msra.mxu0 %v1156_v16  ;;  %1189 = vmatpush3.bf16.msra.mxu1 %v1188_v17  ;;  %v486_v16 = vrot.slane %v477_v12, %v1589_v30  ;;  %v635_v17 = vrot.slane %v626_v13, %v1589_v30 }
 0x117   :  { %1159 = vmatprep.subr.bf16.mxu0 %v1158_v20  ;;  %1191 = vmatprep.subr.bf16.mxu1 %v1190_v21 }
 0x11a   :  { %1161 = vmatpush3.bf16.msra.mxu0 %v1160_v29  ;;  %1193 = vmatpush3.bf16.msra.mxu1 %v1192_v31 }
 0x11b   :  { %1163 = vmatprep.subr.bf16.mxu0 %v1162_v34  ;;  %1195 = vmatprep.subr.bf16.mxu1 %v1194_v35 }
 0x11e   :  { %1165 = vmatpush3.bf16.msra.mxu0 %v1164_v42  ;;  %1197 = vmatpush3.bf16.msra.mxu1 %v1196_v43 }
 0x11f   :  { %1167 = vmatprep.subr.bf16.mxu0 %v1166_v46  ;;  %1199 = vmatprep.subr.bf16.mxu1 %v1198_v47 }
 0x122   :  { %1169 = vmatpush3.bf16.msra.mxu0 %v1168_v54  ;;  %1201 = vmatpush3.bf16.msra.mxu1 %v1200_v55 }
 0x123   :  { %1171 = vmatprep.subr.bf16.mxu0 %v1170_v56  ;;  %1203 = vmatprep.subr.bf16.mxu1 %v1202_v57 }
 0x126   :  { %1173 = vmatpush3.bf16.msra.mxu0 %v1172_v61  ;;  %1205 = vmatpush3.bf16.msra.mxu1 %v1204_v63 }
 0x127   :  { %1175 = vmatprep.subr.bf16.mxu0 %v1174_v3  ;;  %1207 = vmatprep.subr.bf16.mxu1 %v1206_v7 }
 0x12a   :  { %1177 = vmatpush3.bf16.msra.mxu0 %v1176_v8  ;;  %1209 = vmatpush3.bf16.msra.mxu1 %v1208_v11 }
 0x1e0   :  { %v555_v18 = vpop.f32.mrb[2].mxu0  ;;  %v704_v19 = vpop.f32.mrb[2].mxu1 }
 0x1e1   :  { %v556_v20 = vadd.f32 %v555_v18, %v482_v14  ;;  %v705_v21 = vadd.f32 %v704_v19, %v631_v15  ;;  %v557_v22 = vpop.f32.mrb[3].mxu0  ;;  %v706_v23 = vpop.f32.mrb[3].mxu1 }
 0x1e2   :  { %v558_v24 = vadd.f32 %v557_v22, %v486_v16  ;;  %v707_v25 = vadd.f32 %v706_v23, %v635_v17 }
 0x1e3   :  { %v560_v29 = vmax.f32 %v556_v20, 0.0  ;;  %v709_v31 = vmax.f32 %v705_v21, 0.0 }
 0x1e4   :  { %v561_v26 = vmax.f32 %v558_v24, 0.0  ;;  %v710_v28 = vmax.f32 %v707_v25, 0.0 }
 0x1e6   :  { %839 = vmatprep.mubr.f32.mxu0 %v710_v28  ;;  %909 = vmatprep.mubr.f32.mxu1 %v561_v26 }
 0x1e7   :  { %840 = vmatmul.mubr.f32.vlgmr.msra.gmra.mrb[4].mxu0 %v709_v31  ;;  %910 = vmatmul.mubr.f32.vlgmr.msra.gmra.mrb[4].mxu1 %v560_v29 }
 0x2ba   :  { %v972_v27 = vpop.f32.mrb[4].mxu0  ;;  %v1007_v32 = vpop.f32.mrb[4].mxu1 }
 0x2bb   :  { %v973_v33 = vpop.f32.mrb[5].mxu0  ;;  %v1008_v30 = vpop.f32.mrb[5].mxu1 }
 0x2bc   :  { %v974_v34 = vadd.f32 %v973_v33, %v972_v27  ;;  %v1009_v35 = vadd.f32 %v1008_v30, %v1007_v32 }
 0x2be   :  { %v912_v37 = vadd.f32 %v1009_v35, %v974_v34 }
 0x2c0   :  { %v922_v38 = vadd.f32 %v939_v36, %v912_v37 }
 0x2c2   :  { %924 = vst.msk [vmem:[%s1800_s11] sm:$0xff] %vm923_vm3, %v922_v38 }
 0x2c3   :  { %929 = vsyncpa [#allocation3], 1 }
 0x2c4   :  { %930 = vsyncpa [#allocation5], 1 }

// kernel: tpu_custom_call.1
= control target key start
LH: loop header
LB: loop body
LE: loop exit
PB: predicated region body
PF: predicated region fallthrough
CT: control target
= control target key end

     0   :  { %16 = vsyncpa [#allocation3], 0  ;;  %s1789_s0 = inlined_call_operand.vmem [shape: f32[8,16], index: 0, kind: input, shape index: {}]   ;;  %s1790_s1 = inlined_call_operand.vmem [shape: f32[8,4], index: 1, kind: input, shape index: {}]   ;;  %s1791_s2 = inlined_call_operand.hbm [shape: f32[16,512], index: 2, kind: input, shape index: {}]   ;;  %s1792_s3 = inlined_call_operand.vmem [shape: f32[4,512], index: 3, kind: input, shape index: {}]   ;;  %s1793_s4 = inlined_call_operand.vmem [shape: f32[1,512], index: 4, kind: input, shape index: {}]   ;;  %s1794_s5 = inlined_call_operand.vmem [shape: f32[256,256], index: 5, kind: input, shape index: {}]   ;;  %s1795_s6 = inlined_call_operand.vmem [shape: f32[1,256], index: 6, kind: input, shape index: {}]   ;;  %s1796_s7 = inlined_call_operand.hbm [shape: f32[256,256], index: 7, kind: input, shape index: {}]   ;;  %s1797_s8 = inlined_call_operand.vmem [shape: f32[1,256], index: 8, kind: input, shape index: {}]   ;;  %s1798_s9 = inlined_call_operand.vmem [shape: f32[512,2], index: 9, kind: input, shape index: {}]   ;;  %s1799_s10 = inlined_call_operand.vmem [shape: f32[1,2], index: 10, kind: input, shape index: {}]   ;;  %s1800_s11 = inlined_call_operand.vmem [shape: f32[8,2], index: 11, kind: output, shape index: {}]  }
   0x1   :  { %17 = vsyncpa [#allocation5], 0  ;;  %s1271_s17 = smov [#allocation2]   ;;  %s1223_s21 = scalar_lea.hbm %s1791_s2, 1024 }
   0x2   :  { %s27_s18 = sshll.u32 %s1271_s17, 4  ;;  %p1224_p0 = scmp.ne.s32.totalorder %s1791_s2, %s1223_s21  ;;  %s28_s18 = int_to_ptr.vmem [resolvable:$true] %s27_s18 }
   0x3   :  { %p1227_p1 = scmp.lt.u32.totalorder %s1223_s21, %s1791_s2 }
   0x5   :  { %p1229_p2 = pnand %p1227_p1, %p1224_p0 }
   0x7   :  { %1232 = shalt.err (!%p1229_p2)
}
   0x8   :  { %s1233_s26 = scalar_lea.vmem %s28_s18, 1024  ;;  %p1238_p4 = scmp.lt.s32.totalorder %s28_s18, %s28_s18 }
   0x9   :  { %p1234_p3 = scmp.ne.s32.totalorder %s28_s18, %s1233_s26  ;;  %p1239_p5 = scmp.lt.s32.totalorder %s1233_s26, %s1233_s26 }
   0xb   :  { %p1240_p6 = por %p1239_p5, %p1238_p4 }
   0xd   :  { %p1241_p7 = pnand %p1240_p6, %p1234_p3 }
   0xf   :  { %1244 = shalt.err (!%p1241_p7)
}
  0x10   :  { %s1272_s27 = smov 512   ;;  %s1273_s28 = smov 32  }
  0x11   :  { %33 = dma.hbm_to_vmem [thread:$0]  %s1791_s2, 1024, %s28_s18, [#allocation3], %s1272_s27, %s1272_s27, %s1273_s28  }
  0x12   :  { %s1274_s12 = smov [#allocation4]   ;;  %s1245_s16 = scalar_lea.hbm %s1796_s7, 8192 }
  0x13   :  { %s47_s13 = sshll.u32 %s1274_s12, 4  ;;  %p1246_p8 = scmp.ne.s32.totalorder %s1796_s7, %s1245_s16  ;;  %s48_s13 = int_to_ptr.vmem [resolvable:$true] %s47_s13 }
  0x14   :  { %p1249_p9 = scmp.lt.u32.totalorder %s1245_s16, %s1796_s7 }
  0x16   :  { %p1251_p10 = pnand %p1249_p9, %p1246_p8 }
  0x18   :  { %1254 = shalt.err (!%p1251_p10)
}
  0x19   :  { %s1255_s22 = scalar_lea.vmem %s48_s13, 8192  ;;  %p1260_p12 = scmp.lt.s32.totalorder %s48_s13, %s48_s13 }
  0x1a   :  { %p1256_p11 = scmp.ne.s32.totalorder %s48_s13, %s1255_s22  ;;  %p1261_p13 = scmp.lt.s32.totalorder %s1255_s22, %s1255_s22 }
  0x1c   :  { %p1262_p0 = por %p1261_p13, %p1260_p12 }
  0x1e   :  { %p1263_p1 = pnand %p1262_p0, %p1256_p11 }
  0x20   :  { %1266 = shalt.err (!%p1263_p1)
}
  0x21   :  { %s1275_s2 = smov 256   ;;  %s1276_s18 = smov 16  }
  0x22   :  { %53 = dma.hbm_to_vmem [thread:$0]  %s1796_s7, 8192, %s48_s13, [#allocation5], %s1275_s2, %s1275_s2, %s1276_s18  }
  0x23   :  { %1267 = dma.done.wait [#allocation3], 1024  }
  0x24   :  { %1268 = vsyncadd [#allocation3], 4294966272 }
  0x25   :  { %1269 = dma.done.wait [#allocation5], 8192  }
  0x26   :  { %1270 = vsyncadd [#allocation5], 4294959104  ;;  %v1277_v0 = vmov 0.0   ;;  %v76_v1 = vld [vmem:[%s1792_s3] sm:$0xff]  ;;  %vm86_vm0 = vcmask 1043456   ;;  %v77_v2 = vld [vmem:[%s1792_s3 + $0x8] sm:$0xff] }
  0x27   :  { %159 = vmatprep.mubr.f32.mxu0 %v1277_v0  ;;  %230 = vmatprep.mubr.f32.mxu1 %v1277_v0  ;;  %v75_v3 = vld [vmem:[%s1790_s1] sm:$0xff]  ;;  %v80_v4 = vcombine.high %v76_v1, %v76_v1  ;;  %v81_v5 = vcombine.high %v77_v2, %v77_v2  ;;  %v68_v6 = vld [vmem:[#allocation2 + $0x8] sm:$0xff]  ;;  %v70_v8 = vld [vmem:[#allocation2 + $0x18] sm:$0xff]  ;;  %vm82_vm1 = vcmask 31744   ;;  %vm237_vm2 = vcmask 130048  }
  0x28   :  { %v72_v7 = vld [vmem:[#allocation2 + $0x28] sm:$0xff]  ;;  %v74_v10 = vld [vmem:[#allocation2 + $0x38] sm:$0xff]  ;;  %v67_v11 = vld [vmem:[#allocation2] sm:$0xff]  ;;  %vm923_vm3 = vcmask 15360  }
  0x29   :  { %v1010_v9 = vpack.c.bf16 %v72_v7, %v68_v6  ;;  %v71_v12 = vld [vmem:[#allocation2 + $0x20] sm:$0xff]  ;;  %931 = vmatprep.subr.msk.mxu0 %vm86_vm0, %v80_v4  ;;  %934 = vmatprep.subr.msk.mxu1 %vm86_vm0, %v81_v5  ;;  %v1014_v13 = vpack.c.bf16 %v74_v10, %v70_v8  ;;  %v69_v15 = vld [vmem:[#allocation2 + $0x10] sm:$0xff]  ;;  %v414_v18 = vld [vmem:[%s1794_s5 + $0x8] sm:$0xff] }
  0x2a   :  { %v1012_v14 = vpack.c.bf16 %v71_v12, %v67_v11  ;;  %v73_v16 = vld [vmem:[#allocation2 + $0x30] sm:$0xff]  ;;  %932 = vmatpush1.msk.msra.mxu0 %vm86_vm0, %v76_v1  ;;  %935 = vmatpush1.msk.msra.mxu1 %vm86_vm0, %v77_v2  ;;  %v416_v19 = vld [vmem:[%s1794_s5 + $0x18] sm:$0xff]  ;;  %v563_v20 = vld [vmem:[#allocation4 + $0x8] sm:$0xff] }
  0x2b   :  { %v1016_v17 = vpack.c.bf16 %v73_v16, %v69_v15  ;;  %933 = vmatmul.mubr.msk.f32.vlgmr.msra.gmra.mrb[0].mxu0 %vm82_vm1, %v75_v3  ;;  %936 = vmatmul.mubr.msk.f32.vlgmr.msra.gmra.mrb[0].mxu1 %vm82_vm1, %v75_v3  ;;  %v1018_v21 = vpack.c.bf16 %v416_v19, %v414_v18  ;;  %v565_v22 = vld [vmem:[#allocation4 + $0x18] sm:$0xff]  ;;  %v413_v24 = vld [vmem:[%s1794_s5] sm:$0xff]  ;;  %v415_v25 = vld [vmem:[%s1794_s5 + $0x10] sm:$0xff] }
  0x2c   :  { %1011 = vmatprep.subr.bf16.mxu0 %v1010_v9  ;;  %1015 = vmatprep.subr.bf16.mxu1 %v1014_v13  ;;  %v1082_v23 = vpack.c.bf16 %v565_v22, %v563_v20  ;;  %v562_v26 = vld [vmem:[#allocation4] sm:$0xff]  ;;  %v564_v27 = vld [vmem:[#allocation4 + $0x10] sm:$0xff]  ;;  %v418_v28 = vld [vmem:[%s1794_s5 + $0x28] sm:$0xff]  ;;  %v1020_v33 = vpack.c.bf16 %v415_v25, %v413_v24 }
  0x2d   :  { %1013 = vmatpush1.bf16.msra.mxu0 %v1012_v14  ;;  %1017 = vmatpush1.bf16.msra.mxu1 %v1016_v17  ;;  %v420_v29 = vld [vmem:[%s1794_s5 + $0x38] sm:$0xff]  ;;  %v567_v30 = vld [vmem:[#allocation4 + $0x28] sm:$0xff]  ;;  %v66_v32 = vld [vmem:[%s1789_s0] sm:$0xff]  ;;  %v1084_v34 = vpack.c.bf16 %v564_v27, %v562_v26 }
  0x2e   :  { %305 = vmatprep.mubr.f32.mxu0 %v1277_v0  ;;  %376 = vmatprep.mubr.f32.mxu1 %v1277_v0  ;;  %v569_v31 = vld [vmem:[#allocation4 + $0x38] sm:$0xff]  ;;  %v417_v35 = vld [vmem:[%s1794_s5 + $0x20] sm:$0xff]  ;;  %v419_v36 = vld [vmem:[%s1794_s5 + $0x30] sm:$0xff]  ;;  %v1022_v37 = vpack.c.bf16 %v420_v29, %v418_v28 }
  0x2f   :  { %1019 = vmatprep.subr.bf16.mxu0 %v1018_v21  ;;  %1083 = vmatprep.subr.bf16.mxu1 %v1082_v23  ;;  %v1086_v38 = vpack.c.bf16 %v569_v31, %v567_v30  ;;  %v566_v39 = vld [vmem:[#allocation4 + $0x20] sm:$0xff]  ;;  %v568_v40 = vld [vmem:[#allocation4 + $0x30] sm:$0xff]  ;;  %v422_v41 = vld [vmem:[%s1794_s5 + $0x48] sm:$0xff]  ;;  %v1024_v45 = vpack.c.bf16 %v419_v36, %v417_v35 }
  0x30   :  { %v424_v42 = vld [vmem:[%s1794_s5 + $0x58] sm:$0xff]  ;;  %v571_v43 = vld [vmem:[#allocation4 + $0x48] sm:$0xff]  ;;  %v1088_v46 = vpack.c.bf16 %v568_v40, %v566_v39  ;;  %v421_v47 = vld [vmem:[%s1794_s5 + $0x40] sm:$0xff] }
  0x31   :  { %v573_v44 = vld [vmem:[#allocation4 + $0x58] sm:$0xff]  ;;  %v423_v48 = vld [vmem:[%s1794_s5 + $0x50] sm:$0xff]  ;;  %v1026_v49 = vpack.c.bf16 %v424_v42, %v422_v41  ;;  %v570_v51 = vld [vmem:[#allocation4 + $0x40] sm:$0xff] }
  0x32   :  { %v1090_v50 = vpack.c.bf16 %v573_v44, %v571_v43  ;;  %v572_v52 = vld [vmem:[#allocation4 + $0x50] sm:$0xff]  ;;  %v426_v53 = vld [vmem:[%s1794_s5 + $0x68] sm:$0xff]  ;;  %v428_v54 = vld [vmem:[%s1794_s5 + $0x78] sm:$0xff]  ;;  %v1028_v57 = vpack.c.bf16 %v423_v48, %v421_v47 }
  0x33   :  { %937 = vmatmul.mubr.msk.f32.vlgmr.msra.gmra.mrb[0].mxu0 %vm237_vm2, %v66_v32  ;;  %938 = vmatmul.mubr.msk.f32.vlgmr.msra.gmra.mrb[0].mxu1 %vm237_vm2, %v66_v32  ;;  %v575_v55 = vld [vmem:[#allocation4 + $0x68] sm:$0xff]  ;;  %v577_v56 = vld [vmem:[#allocation4 + $0x78] sm:$0xff]  ;;  %v1092_v58 = vpack.c.bf16 %v572_v52, %v570_v51  ;;  %v425_v59 = vld [vmem:[%s1794_s5 + $0x60] sm:$0xff]  ;;  %v1030_v61 = vpack.c.bf16 %v428_v54, %v426_v53 }
  0x34   :  { %1021 = vmatpush1.bf16.msra.mxu0 %v1020_v33  ;;  %1085 = vmatpush1.bf16.msra.mxu1 %v1084_v34  ;;  %v427_v60 = vld [vmem:[%s1794_s5 + $0x70] sm:$0xff]  ;;  %v1094_v62 = vpack.c.bf16 %v577_v56, %v575_v55  ;;  %v574_v63 = vld [vmem:[#allocation4 + $0x60] sm:$0xff]  ;;  %v430_v1 = vld [vmem:[%s1794_s5 + $0x88] sm:$0xff] }
  0x35   :  { %1023 = vmatprep.subr.bf16.mxu0 %v1022_v37  ;;  %1087 = vmatprep.subr.bf16.mxu1 %v1086_v38  ;;  %v576_v0 = vld [vmem:[#allocation4 + $0x70] sm:$0xff]  ;;  %v432_v2 = vld [vmem:[%s1794_s5 + $0x98] sm:$0xff]  ;;  %v579_v3 = vld [vmem:[#allocation4 + $0x88] sm:$0xff]  ;;  %v1032_v5 = vpack.c.bf16 %v427_v60, %v425_v59 }
  0x36   :  { %v581_v4 = vld [vmem:[#allocation4 + $0x98] sm:$0xff]  ;;  %v1096_v6 = vpack.c.bf16 %v576_v0, %v574_v63  ;;  %v429_v7 = vld [vmem:[%s1794_s5 + $0x80] sm:$0xff]  ;;  %v431_v8 = vld [vmem:[%s1794_s5 + $0x90] sm:$0xff]  ;;  %v1034_v9 = vpack.c.bf16 %v432_v2, %v430_v1 }
  0x37   :  { %v1098_v10 = vpack.c.bf16 %v581_v4, %v579_v3  ;;  %v578_v11 = vld [vmem:[#allocation4 + $0x80] sm:$0xff]  ;;  %v580_v12 = vld [vmem:[#allocation4 + $0x90] sm:$0xff]  ;;  %v434_v13 = vld [vmem:[%s1794_s5 + $0xa8] sm:$0xff]  ;;  %v1036_v17 = vpack.c.bf16 %v431_v8, %v429_v7 }
  0x38   :  { %1025 = vmatpush1.bf16.msra.mxu0 %v1024_v45  ;;  %1089 = vmatpush1.bf16.msra.mxu1 %v1088_v46  ;;  %v436_v14 = vld [vmem:[%s1794_s5 + $0xb8] sm:$0xff]  ;;  %v583_v15 = vld [vmem:[#allocation4 + $0xa8] sm:$0xff]  ;;  %v1100_v18 = vpack.c.bf16 %v580_v12, %v578_v11  ;;  %v433_v19 = vld [vmem:[%s1794_s5 + $0xa0] sm:$0xff] }
  0x39   :  { %1027 = vmatprep.subr.bf16.mxu0 %v1026_v49  ;;  %1091 = vmatprep.subr.bf16.mxu1 %v1090_v50  ;;  %v585_v16 = vld [vmem:[#allocation4 + $0xb8] sm:$0xff]  ;;  %v435_v20 = vld [vmem:[%s1794_s5 + $0xb0] sm:$0xff]  ;;  %v1038_v21 = vpack.c.bf16 %v436_v14, %v434_v13  ;;  %v582_v23 = vld [vmem:[#allocation4 + $0xa0] sm:$0xff] }
  0x3a   :  { %v1102_v22 = vpack.c.bf16 %v585_v16, %v583_v15  ;;  %v584_v24 = vld [vmem:[#allocation4 + $0xb0] sm:$0xff]  ;;  %v438_v25 = vld [vmem:[%s1794_s5 + $0xc8] sm:$0xff]  ;;  %v440_v26 = vld [vmem:[%s1794_s5 + $0xd8] sm:$0xff]  ;;  %v1040_v29 = vpack.c.bf16 %v435_v20, %v433_v19 }
  0x3b   :  { %v587_v27 = vld [vmem:[#allocation4 + $0xc8] sm:$0xff]  ;;  %v589_v28 = vld [vmem:[#allocation4 + $0xd8] sm:$0xff]  ;;  %v1104_v30 = vpack.c.bf16 %v584_v24, %v582_v23  ;;  %v437_v31 = vld [vmem:[%s1794_s5 + $0xc0] sm:$0xff]  ;;  %v1042_v33 = vpack.c.bf16 %v440_v26, %v438_v25 }
  0x3c   :  { %1029 = vmatpush1.bf16.msra.mxu0 %v1028_v57  ;;  %1093 = vmatpush1.bf16.msra.mxu1 %v1092_v58  ;;  %v439_v32 = vld [vmem:[%s1794_s5 + $0xd0] sm:$0xff]  ;;  %v1106_v34 = vpack.c.bf16 %v589_v28, %v587_v27  ;;  %v586_v35 = vld [vmem:[#allocation4 + $0xc0] sm:$0xff]  ;;  %v442_v37 = vld [vmem:[%s1794_s5 + $0xe8] sm:$0xff] }
  0x3d   :  { %1031 = vmatprep.subr.bf16.mxu0 %v1030_v61  ;;  %1095 = vmatprep.subr.bf16.mxu1 %v1094_v62  ;;  %v588_v36 = vld [vmem:[#allocation4 + $0xd0] sm:$0xff]  ;;  %v444_v38 = vld [vmem:[%s1794_s5 + $0xf8] sm:$0xff]  ;;  %v591_v39 = vld [vmem:[#allocation4 + $0xe8] sm:$0xff]  ;;  %v1044_v41 = vpack.c.bf16 %v439_v32, %v437_v31 }
  0x3e   :  { %v593_v40 = vld [vmem:[#allocation4 + $0xf8] sm:$0xff]  ;;  %v1108_v42 = vpack.c.bf16 %v588_v36, %v586_v35  ;;  %v441_v43 = vld [vmem:[%s1794_s5 + $0xe0] sm:$0xff]  ;;  %v443_v44 = vld [vmem:[%s1794_s5 + $0xf0] sm:$0xff]  ;;  %v1046_v45 = vpack.c.bf16 %v444_v38, %v442_v37 }
  0x3f   :  { %v1110_v46 = vpack.c.bf16 %v593_v40, %v591_v39  ;;  %v590_v47 = vld [vmem:[#allocation4 + $0xe0] sm:$0xff]  ;;  %v592_v48 = vld [vmem:[#allocation4 + $0xf0] sm:$0xff]  ;;  %v446_v49 = vld [vmem:[%s1794_s5 + $0x108] sm:$0xff]  ;;  %v1048_v53 = vpack.c.bf16 %v443_v44, %v441_v43 }
  0x40   :  { %1033 = vmatpush1.bf16.msra.mxu0 %v1032_v5  ;;  %1097 = vmatpush1.bf16.msra.mxu1 %v1096_v6  ;;  %v448_v50 = vld [vmem:[%s1794_s5 + $0x118] sm:$0xff]  ;;  %v595_v51 = vld [vmem:[#allocation4 + $0x108] sm:$0xff]  ;;  %v1112_v54 = vpack.c.bf16 %v592_v48, %v590_v47  ;;  %v445_v55 = vld [vmem:[%s1794_s5 + $0x100] sm:$0xff] }
  0x41   :  { %1035 = vmatprep.subr.bf16.mxu0 %v1034_v9  ;;  %1099 = vmatprep.subr.bf16.mxu1 %v1098_v10  ;;  %v597_v52 = vld [vmem:[#allocation4 + $0x118] sm:$0xff]  ;;  %v447_v56 = vld [vmem:[%s1794_s5 + $0x110] sm:$0xff]  ;;  %v1050_v57 = vpack.c.bf16 %v448_v50, %v446_v49  ;;  %v594_v59 = vld [vmem:[#allocation4 + $0x100] sm:$0xff] }
  0x42   :  { %v1114_v58 = vpack.c.bf16 %v597_v52, %v595_v51  ;;  %v596_v60 = vld [vmem:[#allocation4 + $0x110] sm:$0xff]  ;;  %v450_v61 = vld [vmem:[%s1794_s5 + $0x128] sm:$0xff]  ;;  %v452_v62 = vld [vmem:[%s1794_s5 + $0x138] sm:$0xff]  ;;  %v1052_v1 = vpack.c.bf16 %v447_v56, %v445_v55 }
  0x43   :  { %v599_v63 = vld [vmem:[#allocation4 + $0x128] sm:$0xff]  ;;  %v601_v0 = vld [vmem:[#allocation4 + $0x138] sm:$0xff]  ;;  %v1116_v2 = vpack.c.bf16 %v596_v60, %v594_v59  ;;  %v449_v3 = vld [vmem:[%s1794_s5 + $0x120] sm:$0xff]  ;;  %v1054_v5 = vpack.c.bf16 %v452_v62, %v450_v61 }
  0x44   :  { %1037 = vmatpush1.bf16.msra.mxu0 %v1036_v17  ;;  %1101 = vmatpush1.bf16.msra.mxu1 %v1100_v18  ;;  %v451_v4 = vld [vmem:[%s1794_s5 + $0x130] sm:$0xff]  ;;  %v1118_v6 = vpack.c.bf16 %v601_v0, %v599_v63  ;;  %v598_v7 = vld [vmem:[#allocation4 + $0x120] sm:$0xff]  ;;  %v454_v9 = vld [vmem:[%s1794_s5 + $0x148] sm:$0xff] }
  0x45   :  { %1039 = vmatprep.subr.bf16.mxu0 %v1038_v21  ;;  %1103 = vmatprep.subr.bf16.mxu1 %v1102_v22  ;;  %v600_v8 = vld [vmem:[#allocation4 + $0x130] sm:$0xff]  ;;  %v456_v10 = vld [vmem:[%s1794_s5 + $0x158] sm:$0xff]  ;;  %v603_v11 = vld [vmem:[#allocation4 + $0x148] sm:$0xff]  ;;  %v1056_v13 = vpack.c.bf16 %v451_v4, %v449_v3 }
  0x46   :  { %v605_v12 = vld [vmem:[#allocation4 + $0x158] sm:$0xff]  ;;  %v1120_v14 = vpack.c.bf16 %v600_v8, %v598_v7  ;;  %v453_v15 = vld [vmem:[%s1794_s5 + $0x140] sm:$0xff]  ;;  %v455_v16 = vld [vmem:[%s1794_s5 + $0x150] sm:$0xff]  ;;  %v1058_v17 = vpack.c.bf16 %v456_v10, %v454_v9 }
  0x47   :  { %v1122_v18 = vpack.c.bf16 %v605_v12, %v603_v11  ;;  %v602_v19 = vld [vmem:[#allocation4 + $0x140] sm:$0xff]  ;;  %v604_v20 = vld [vmem:[#allocation4 + $0x150] sm:$0xff]  ;;  %v458_v21 = vld [vmem:[%s1794_s5 + $0x168] sm:$0xff]  ;;  %v1060_v25 = vpack.c.bf16 %v455_v16, %v453_v15 }
  0x48   :  { %1041 = vmatpush1.bf16.msra.mxu0 %v1040_v29  ;;  %1105 = vmatpush1.bf16.msra.mxu1 %v1104_v30  ;;  %v460_v22 = vld [vmem:[%s1794_s5 + $0x178] sm:$0xff]  ;;  %v607_v23 = vld [vmem:[#allocation4 + $0x168] sm:$0xff]  ;;  %v1124_v26 = vpack.c.bf16 %v604_v20, %v602_v19  ;;  %v457_v27 = vld [vmem:[%s1794_s5 + $0x160] sm:$0xff] }
  0x49   :  { %1043 = vmatprep.subr.bf16.mxu0 %v1042_v33  ;;  %1107 = vmatprep.subr.bf16.mxu1 %v1106_v34  ;;  %v609_v24 = vld [vmem:[#allocation4 + $0x178] sm:$0xff]  ;;  %v459_v28 = vld [vmem:[%s1794_s5 + $0x170] sm:$0xff]  ;;  %v1062_v29 = vpack.c.bf16 %v460_v22, %v458_v21  ;;  %v606_v31 = vld [vmem:[#allocation4 + $0x160] sm:$0xff] }
  0x4a   :  { %v1126_v30 = vpack.c.bf16 %v609_v24, %v607_v23  ;;  %v608_v32 = vld [vmem:[#allocation4 + $0x170] sm:$0xff]  ;;  %v462_v33 = vld [vmem:[%s1794_s5 + $0x188] sm:$0xff]  ;;  %v464_v34 = vld [vmem:[%s1794_s5 + $0x198] sm:$0xff]  ;;  %v1064_v37 = vpack.c.bf16 %v459_v28, %v457_v27 }
  0x4b   :  { %v611_v35 = vld [vmem:[#allocation4 + $0x188] sm:$0xff]  ;;  %v613_v36 = vld [vmem:[#allocation4 + $0x198] sm:$0xff]  ;;  %v1128_v38 = vpack.c.bf16 %v608_v32, %v606_v31  ;;  %v461_v39 = vld [vmem:[%s1794_s5 + $0x180] sm:$0xff] }
  0x4c   :  { %1045 = vmatpush1.bf16.msra.mxu0 %v1044_v41  ;;  %1109 = vmatpush1.bf16.msra.mxu1 %v1108_v42  ;;  %v463_v40 = vld [vmem:[%s1794_s5 + $0x190] sm:$0xff]  ;;  %v1066_v41 = vpack.c.bf16 %v464_v34, %v462_v33  ;;  %v1130_v42 = vpack.c.bf16 %v613_v36, %v611_v35  ;;  %v610_v43 = vld [vmem:[#allocation4 + $0x180] sm:$0xff]  ;;  %v615_v47 = vld [vmem:[#allocation4 + $0x1a8] sm:$0xff] }
  0x4d   :  { %1047 = vmatprep.subr.bf16.mxu0 %v1046_v45  ;;  %1111 = vmatprep.subr.bf16.mxu1 %v1110_v46  ;;  %v612_v44 = vld [vmem:[#allocation4 + $0x190] sm:$0xff]  ;;  %v466_v45 = vld [vmem:[%s1794_s5 + $0x1a8] sm:$0xff]  ;;  %v468_v46 = vld [vmem:[%s1794_s5 + $0x1b8] sm:$0xff]  ;;  %v1068_v49 = vpack.c.bf16 %v463_v40, %v461_v39 }
  0x4e   :  { %v617_v48 = vld [vmem:[#allocation4 + $0x1b8] sm:$0xff]  ;;  %v1132_v50 = vpack.c.bf16 %v612_v44, %v610_v43  ;;  %v465_v51 = vld [vmem:[%s1794_s5 + $0x1a0] sm:$0xff]  ;;  %v467_v52 = vld [vmem:[%s1794_s5 + $0x1b0] sm:$0xff] }
  0x4f   :  { %v614_v55 = vld [vmem:[#allocation4 + $0x1a0] sm:$0xff]  ;;  %v616_v56 = vld [vmem:[#allocation4 + $0x1b0] sm:$0xff]  ;;  %v619_v59 = vld [vmem:[#allocation4 + $0x1c8] sm:$0xff]  ;;  %v1072_v61 = vpack.c.bf16 %v467_v52, %v465_v51 }
  0x50   :  { %1049 = vmatpush1.bf16.msra.mxu0 %v1048_v53  ;;  %1113 = vmatpush1.bf16.msra.mxu1 %v1112_v54  ;;  %v1070_v53 = vpack.c.bf16 %v468_v46, %v466_v45  ;;  %v1134_v54 = vpack.c.bf16 %v617_v48, %v615_v47  ;;  %v621_v60 = vld [vmem:[#allocation4 + $0x1d8] sm:$0xff]  ;;  %v1136_v62 = vpack.c.bf16 %v616_v56, %v614_v55  ;;  %v618_v3 = vld [vmem:[#allocation4 + $0x1c0] sm:$0xff]  ;;  %v474_v7 = vld [vmem:[%s1794_s5 + $0x1e8] sm:$0xff] }
  0x51   :  { %1051 = vmatprep.subr.bf16.mxu0 %v1050_v57  ;;  %1115 = vmatprep.subr.bf16.mxu1 %v1114_v58  ;;  %v470_v57 = vld [vmem:[%s1794_s5 + $0x1c8] sm:$0xff]  ;;  %v472_v58 = vld [vmem:[%s1794_s5 + $0x1d8] sm:$0xff]  ;;  %v1138_v0 = vpack.c.bf16 %v621_v60, %v619_v59  ;;  %v473_v12 = vld [vmem:[%s1794_s5 + $0x1e0] sm:$0xff] }
  0x52   :  { %v1074_v63 = vpack.c.bf16 %v472_v58, %v470_v57  ;;  %v476_v8 = vld [vmem:[%s1794_s5 + $0x1f8] sm:$0xff]  ;;  %v623_v9 = vld [vmem:[#allocation4 + $0x1e8] sm:$0xff]  ;;  %v622_v16 = vld [vmem:[#allocation4 + $0x1e0] sm:$0xff] }
  0x53   :  { %v1078_v10 = vpack.c.bf16 %v476_v8, %v474_v7  ;;  %v625_v11 = vld [vmem:[#allocation4 + $0x1f8] sm:$0xff]  ;;  %v759_v19 = vld [vmem:[%s1798_s9 + $0x180] sm:$0xff]  ;;  %v760_v20 = vld [vmem:[%s1798_s9 + $0x188] sm:$0xff] }
  0x54   :  { %1053 = vmatpush1.bf16.msra.mxu0 %v1052_v1  ;;  %1117 = vmatpush1.bf16.msra.mxu1 %v1116_v2  ;;  %v469_v1 = vld [vmem:[%s1794_s5 + $0x1c0] sm:$0xff]  ;;  %v471_v2 = vld [vmem:[%s1794_s5 + $0x1d0] sm:$0xff]  ;;  %v1146_v22 = vpack.c.bf16 %v760_v20, %v759_v19  ;;  %v728_v23 = vld [vmem:[%s1798_s9 + $0x88] sm:$0xff] }
  0x55   :  { %1055 = vmatprep.subr.bf16.mxu0 %v1054_v5  ;;  %1119 = vmatprep.subr.bf16.mxu1 %v1118_v6  ;;  %v1076_v4 = vpack.c.bf16 %v471_v2, %v469_v1  ;;  %v620_v5 = vld [vmem:[#allocation4 + $0x1d0] sm:$0xff]  ;;  %v727_v21 = vld [vmem:[%s1798_s9 + $0x80] sm:$0xff]  ;;  %v744_v39 = vld [vmem:[%s1798_s9 + $0x108] sm:$0xff] }
  0x56   :  { %v1140_v6 = vpack.c.bf16 %v620_v5, %v618_v3  ;;  %v1178_v24 = vpack.c.bf16 %v728_v23, %v727_v21  ;;  %v711_v44 = vld [vmem:[%s1798_s9] sm:$0xff]  ;;  %v712_v45 = vld [vmem:[%s1798_s9 + $0x8] sm:$0xff]  ;;  %v761_v46 = vld [vmem:[%s1798_s9 + $0x190] sm:$0xff] }
  0x57   :  { %v730_v51 = vld [vmem:[%s1798_s9 + $0x98] sm:$0xff]  ;;  %v1180_v55 = vpack.c.bf16 %v712_v45, %v711_v44  ;;  %v745_v56 = vld [vmem:[%s1798_s9 + $0x110] sm:$0xff]  ;;  %v764_v1 = vld [vmem:[%s1798_s9 + $0x1a8] sm:$0xff] }
  0x58   :  { %1057 = vmatpush1.bf16.msra.mxu0 %v1056_v13  ;;  %1121 = vmatpush1.bf16.msra.mxu1 %v1120_v14  ;;  %v475_v13 = vld [vmem:[%s1794_s5 + $0x1f0] sm:$0xff]  ;;  %v1142_v14 = vpack.c.bf16 %v625_v11, %v623_v9  ;;  %v746_v57 = vld [vmem:[%s1798_s9 + $0x118] sm:$0xff]  ;;  %v731_v2 = vld [vmem:[%s1798_s9 + $0xa0] sm:$0xff] }
  0x59   :  { %1059 = vmatprep.subr.bf16.mxu0 %v1058_v17  ;;  %1123 = vmatprep.subr.bf16.mxu1 %v1122_v18  ;;  %v1080_v15 = vpack.c.bf16 %v475_v13, %v473_v12  ;;  %v624_v17 = vld [vmem:[#allocation4 + $0x1f0] sm:$0xff]  ;;  %v732_v3 = vld [vmem:[%s1798_s9 + $0xa8] sm:$0xff]  ;;  %v766_v13 = vld [vmem:[%s1798_s9 + $0x1b8] sm:$0xff] }
  0x5a   :  { %v1144_v18 = vpack.c.bf16 %v624_v17, %v622_v16  ;;  %v748_v7 = vld [vmem:[%s1798_s9 + $0x128] sm:$0xff]  ;;  %v1186_v9 = vpack.c.bf16 %v732_v3, %v731_v2  ;;  %v765_v12 = vld [vmem:[%s1798_s9 + $0x1b0] sm:$0xff]  ;;  %v750_v19 = vld [vmem:[%s1798_s9 + $0x138] sm:$0xff] }
  0x5b   :  { %v716_v11 = vld [vmem:[%s1798_s9 + $0x28] sm:$0xff]  ;;  %v1158_v20 = vpack.c.bf16 %v766_v13, %v765_v12  ;;  %v718_v23 = vld [vmem:[%s1798_s9 + $0x38] sm:$0xff]  ;;  %v753_v44 = vld [vmem:[%s1798_s9 + $0x150] sm:$0xff] }
  0x5c   :  { %1061 = vmatpush1.bf16.msra.mxu0 %v1060_v25  ;;  %1125 = vmatpush1.bf16.msra.mxu1 %v1124_v26  ;;  %v385_v25 = vlaneseq  ;;  %v754_v45 = vld [vmem:[%s1798_s9 + $0x158] sm:$0xff]  ;;  %v741_v2 = vld [vmem:[%s1798_s9 + $0xf0] sm:$0xff]  ;;  %v477_v12 = vld [vmem:[%s1795_s6] sm:$0x3] }
  0x5d   :  { %1063 = vmatprep.subr.bf16.mxu0 %v1062_v29  ;;  %1127 = vmatprep.subr.bf16.mxu1 %v1126_v30  ;;  %v383_v29 = vld [vmem:[%s1793_s4] sm:$0xf] }
  0x5e   :  { %v386_v26 = vshrl.u32 %v385_v25, 7  ;;  %v768_v25 = vld [vmem:[%s1798_s9 + $0x1c8] sm:$0xff]  ;;  %v626_v13 = vld [vmem:[%s1797_s8] sm:$0x3] }
  0x60   :  { %1065 = vmatpush1.bf16.msra.mxu0 %v1064_v37  ;;  %1129 = vmatpush1.bf16.msra.mxu1 %v1128_v38  ;;  %v1584_v27 = vsub.s32 0, %v386_v26  ;;  %v395_v28 = vsub.s32 2, %v386_v26  ;;  %v1589_v30 = vsub.s32 1, %v386_v26  ;;  %v399_v31 = vsub.s32 3, %v386_v26  ;;  %v743_v38 = vld [vmem:[%s1798_s9 + $0x100] sm:$0xff] }
  0x61   :  { %1067 = vmatprep.subr.bf16.mxu0 %v1066_v41  ;;  %1131 = vmatprep.subr.bf16.mxu1 %v1130_v42  ;;  %v735_v26 = vld [vmem:[%s1798_s9 + $0xc0] sm:$0xff] }
  0x62   :  { %v388_v32 = vrot.slane %v383_v29, %v1584_v27  ;;  %v396_v33 = vrot.slane %v383_v29, %v395_v28  ;;  %v392_v34 = vrot.slane %v383_v29, %v1589_v30  ;;  %v400_v35 = vrot.slane %v383_v29, %v399_v31  ;;  %v736_v28 = vld [vmem:[%s1798_s9 + $0xc8] sm:$0xff] }
  0x64   :  { %1069 = vmatpush1.bf16.msra.mxu0 %v1068_v49  ;;  %1133 = vmatpush1.bf16.msra.mxu1 %v1132_v50  ;;  %v762_v49 = vld [vmem:[%s1798_s9 + $0x198] sm:$0xff]  ;;  %v729_v50 = vld [vmem:[%s1798_s9 + $0x90] sm:$0xff] }
  0x65   :  { %1071 = vmatprep.subr.bf16.mxu0 %v1070_v53  ;;  %1135 = vmatprep.subr.bf16.mxu1 %v1134_v54  ;;  %v1148_v54 = vpack.c.bf16 %v744_v39, %v743_v38  ;;  %v1150_v60 = vpack.c.bf16 %v762_v49, %v761_v46  ;;  %v769_v38 = vld [vmem:[%s1798_s9 + $0x1d0] sm:$0xff]  ;;  %v770_v39 = vld [vmem:[%s1798_s9 + $0x1d8] sm:$0xff] }
  0x66   :  { %v1166_v46 = vpack.c.bf16 %v770_v39, %v769_v38  ;;  %v722_v49 = vld [vmem:[%s1798_s9 + $0x58] sm:$0xff] }
  0x68   :  { %1073 = vmatpush1.bf16.msra.mxu0 %v1072_v61  ;;  %1137 = vmatpush1.bf16.msra.mxu1 %v1136_v62  ;;  %v1182_v61 = vpack.c.bf16 %v730_v51, %v729_v50  ;;  %v713_v62 = vld [vmem:[%s1798_s9 + $0x10] sm:$0xff]  ;;  %v771_v50 = vld [vmem:[%s1798_s9 + $0x1e0] sm:$0xff]  ;;  %v772_v51 = vld [vmem:[%s1798_s9 + $0x1e8] sm:$0xff] }
  0x69   :  { %1075 = vmatprep.subr.bf16.mxu0 %v1074_v63  ;;  %1139 = vmatprep.subr.bf16.mxu1 %v1138_v0  ;;  %v714_v63 = vld [vmem:[%s1798_s9 + $0x18] sm:$0xff]  ;;  %v763_v0 = vld [vmem:[%s1798_s9 + $0x1a0] sm:$0xff] }
  0x6a   :  { %v1184_v5 = vpack.c.bf16 %v714_v63, %v713_v62  ;;  %v1154_v8 = vpack.c.bf16 %v764_v1, %v763_v0  ;;  %v724_v62 = vld [vmem:[%s1798_s9 + $0x68] sm:$0xff]  ;;  %v773_v0 = vld [vmem:[%s1798_s9 + $0x1f0] sm:$0xff]  ;;  %v774_v1 = vld [vmem:[%s1798_s9 + $0x1f8] sm:$0xff] }
  0x6b   :  { %v1174_v3 = vpack.c.bf16 %v774_v1, %v773_v0 }
  0x6c   :  { %1077 = vmatpush1.bf16.msra.mxu0 %v1076_v4  ;;  %1141 = vmatpush1.bf16.msra.mxu1 %v1140_v6  ;;  %v1152_v4 = vpack.c.bf16 %v746_v57, %v745_v56  ;;  %v747_v6 = vld [vmem:[%s1798_s9 + $0x120] sm:$0xff]  ;;  %v1170_v56 = vpack.c.bf16 %v772_v51, %v771_v50 }
  0x6d   :  { %1079 = vmatprep.subr.bf16.mxu0 %v1078_v10  ;;  %1143 = vmatprep.subr.bf16.mxu1 %v1142_v14  ;;  %v715_v10 = vld [vmem:[%s1798_s9 + $0x20] sm:$0xff]  ;;  %v733_v14 = vld [vmem:[%s1798_s9 + $0xb0] sm:$0xff]  ;;  %v1156_v16 = vpack.c.bf16 %v748_v7, %v747_v6  ;;  %v758_v6 = vld [vmem:[%s1798_s9 + $0x178] sm:$0xff] }
  0x6e   :  { %v1188_v17 = vpack.c.bf16 %v716_v11, %v715_v10  ;;  %v726_v10 = vld [vmem:[%s1798_s9 + $0x78] sm:$0xff] }
  0x70   :  { %1081 = vmatpush1.bf16.msra.mxu0 %v1080_v15  ;;  %1145 = vmatpush1.bf16.msra.mxu1 %v1144_v18  ;;  %v734_v15 = vld [vmem:[%s1798_s9 + $0xb8] sm:$0xff]  ;;  %v749_v18 = vld [vmem:[%s1798_s9 + $0x130] sm:$0xff] }
  0x71   :  { %1147 = vmatprep.subr.bf16.mxu0 %v1146_v22  ;;  %1179 = vmatprep.subr.bf16.mxu1 %v1178_v24  ;;  %v1190_v21 = vpack.c.bf16 %v734_v15, %v733_v14  ;;  %v717_v22 = vld [vmem:[%s1798_s9 + $0x30] sm:$0xff]  ;;  %v767_v24 = vld [vmem:[%s1798_s9 + $0x1c0] sm:$0xff]  ;;  %v1160_v29 = vpack.c.bf16 %v750_v19, %v749_v18  ;;  %v482_v14 = vrot.slane %v477_v12, %v1584_v27 }
  0x72   :  { %v1192_v31 = vpack.c.bf16 %v718_v23, %v717_v22  ;;  %v631_v15 = vrot.slane %v626_v13, %v1584_v27 }
 0x106   :  { %v307_v36 = vpop.f32.mrb[0].mxu0  ;;  %v378_v37 = vpop.f32.mrb[0].mxu1 }
 0x107   :  { %v405_v40 = vadd.f32 %v388_v32, %v307_v36  ;;  %v407_v41 = vadd.f32 %v396_v33, %v378_v37  ;;  %v309_v42 = vpop.f32.mrb[1].mxu0  ;;  %v380_v43 = vpop.f32.mrb[1].mxu1  ;;  %v751_v32 = vld [vmem:[%s1798_s9 + $0x140] sm:$0xff]  ;;  %v752_v33 = vld [vmem:[%s1798_s9 + $0x148] sm:$0xff] }
 0x108   :  { %v406_v47 = vadd.f32 %v392_v34, %v309_v42  ;;  %v408_v48 = vadd.f32 %v400_v35, %v380_v43  ;;  %v1162_v34 = vpack.c.bf16 %v768_v25, %v767_v24  ;;  %v1194_v35 = vpack.c.bf16 %v736_v28, %v735_v26  ;;  %v719_v36 = vld [vmem:[%s1798_s9 + $0x40] sm:$0xff]  ;;  %v720_v37 = vld [vmem:[%s1798_s9 + $0x48] sm:$0xff] }
 0x109   :  { %v409_v58 = vmax.f32 %v405_v40, 0.0  ;;  %v411_v59 = vmax.f32 %v407_v41, 0.0  ;;  %v737_v40 = vld [vmem:[%s1798_s9 + $0xd0] sm:$0xff]  ;;  %v738_v41 = vld [vmem:[%s1798_s9 + $0xd8] sm:$0xff]  ;;  %v1164_v42 = vpack.c.bf16 %v752_v33, %v751_v32  ;;  %v1196_v43 = vpack.c.bf16 %v720_v37, %v719_v36  ;;  %v939_v36 = vld [vmem:[%s1799_s10] ss:$0 sm:$0xff] }
 0x10a   :  { %v410_v52 = vmax.f32 %v406_v47, 0.0  ;;  %v412_v53 = vmax.f32 %v408_v48, 0.0  ;;  %v1198_v47 = vpack.c.bf16 %v738_v41, %v737_v40  ;;  %v721_v48 = vld [vmem:[%s1798_s9 + $0x50] sm:$0xff] }
 0x10c   :  { %553 = vmatprep.mubr.f32.mxu0 %v410_v52  ;;  %702 = vmatprep.mubr.f32.mxu1 %v412_v53  ;;  %v739_v52 = vld [vmem:[%s1798_s9 + $0xe0] sm:$0xff]  ;;  %v740_v53 = vld [vmem:[%s1798_s9 + $0xe8] sm:$0xff] }
 0x10d   :  { %554 = vmatmul.mubr.f32.vlgmr.msra.gmra.mrb[2].mxu0 %v409_v58  ;;  %703 = vmatmul.mubr.f32.vlgmr.msra.gmra.mrb[2].mxu1 %v411_v59  ;;  %v1202_v57 = vpack.c.bf16 %v740_v53, %v739_v52  ;;  %v755_v58 = vld [vmem:[%s1798_s9 + $0x160] sm:$0xff]  ;;  %v756_v59 = vld [vmem:[%s1798_s9 + $0x168] sm:$0xff] }
 0x10e   :  { %1149 = vmatpush3.bf16.msra.mxu0 %v1148_v54  ;;  %1181 = vmatpush3.bf16.msra.mxu1 %v1180_v55  ;;  %v1168_v54 = vpack.c.bf16 %v754_v45, %v753_v44  ;;  %v1200_v55 = vpack.c.bf16 %v722_v49, %v721_v48 }
 0x10f   :  { %1151 = vmatprep.subr.bf16.mxu0 %v1150_v60  ;;  %1183 = vmatprep.subr.bf16.mxu1 %v1182_v61  ;;  %v723_v60 = vld [vmem:[%s1798_s9 + $0x60] sm:$0xff]  ;;  %v1172_v61 = vpack.c.bf16 %v756_v59, %v755_v58 }
 0x110   :  { %v1204_v63 = vpack.c.bf16 %v724_v62, %v723_v60 }
 0x112   :  { %1153 = vmatpush3.bf16.msra.mxu0 %v1152_v4  ;;  %1185 = vmatpush3.bf16.msra.mxu1 %v1184_v5  ;;  %v742_v4 = vld [vmem:[%s1798_s9 + $0xf8] sm:$0xff]  ;;  %v757_v5 = vld [vmem:[%s1798_s9 + $0x170] sm:$0xff] }
 0x113   :  { %1155 = vmatprep.subr.bf16.mxu0 %v1154_v8  ;;  %1187 = vmatprep.subr.bf16.mxu1 %v1186_v9  ;;  %v1206_v7 = vpack.c.bf16 %v742_v4, %v741_v2  ;;  %v1176_v8 = vpack.c.bf16 %v758_v6, %v757_v5  ;;  %v725_v9 = vld [vmem:[%s1798_s9 + $0x70] sm:$0xff] }
 0x114   :  { %v1208_v11 = vpack.c.bf16 %v726_v10, %v725_v9 }
 0x116   :  { %1157 = vmatpush3.bf16.msra.mxu0 %v1156_v16  ;;  %1189 = vmatpush3.bf16.msra.mxu1 %v1188_v17  ;;  %v486_v16 = vrot.slane %v477_v12, %v1589_v30  ;;  %v635_v17 = vrot.slane %v626_v13, %v1589_v30 }
 0x117   :  { %1159 = vmatprep.subr.bf16.mxu0 %v1158_v20  ;;  %1191 = vmatprep.subr.bf16.mxu1 %v1190_v21 }
 0x11a   :  { %1161 = vmatpush3.bf16.msra.mxu0 %v1160_v29  ;;  %1193 = vmatpush3.bf16.msra.mxu1 %v1192_v31 }
 0x11b   :  { %1163 = vmatprep.subr.bf16.mxu0 %v1162_v34  ;;  %1195 = vmatprep.subr.bf16.mxu1 %v1194_v35 }
 0x11e   :  { %1165 = vmatpush3.bf16.msra.mxu0 %v1164_v42  ;;  %1197 = vmatpush3.bf16.msra.mxu1 %v1196_v43 }
 0x11f   :  { %1167 = vmatprep.subr.bf16.mxu0 %v1166_v46  ;;  %1199 = vmatprep.subr.bf16.mxu1 %v1198_v47 }
 0x122   :  { %1169 = vmatpush3.bf16.msra.mxu0 %v1168_v54  ;;  %1201 = vmatpush3.bf16.msra.mxu1 %v1200_v55 }
 0x123   :  { %1171 = vmatprep.subr.bf16.mxu0 %v1170_v56  ;;  %1203 = vmatprep.subr.bf16.mxu1 %v1202_v57 }
 0x126   :  { %1173 = vmatpush3.bf16.msra.mxu0 %v1172_v61  ;;  %1205 = vmatpush3.bf16.msra.mxu1 %v1204_v63 }
 0x127   :  { %1175 = vmatprep.subr.bf16.mxu0 %v1174_v3  ;;  %1207 = vmatprep.subr.bf16.mxu1 %v1206_v7 }
 0x12a   :  { %1177 = vmatpush3.bf16.msra.mxu0 %v1176_v8  ;;  %1209 = vmatpush3.bf16.msra.mxu1 %v1208_v11 }
 0x1e0   :  { %v555_v18 = vpop.f32.mrb[2].mxu0  ;;  %v704_v19 = vpop.f32.mrb[2].mxu1 }
 0x1e1   :  { %v556_v20 = vadd.f32 %v555_v18, %v482_v14  ;;  %v705_v21 = vadd.f32 %v704_v19, %v631_v15  ;;  %v557_v22 = vpop.f32.mrb[3].mxu0  ;;  %v706_v23 = vpop.f32.mrb[3].mxu1 }
 0x1e2   :  { %v558_v24 = vadd.f32 %v557_v22, %v486_v16  ;;  %v707_v25 = vadd.f32 %v706_v23, %v635_v17 }
 0x1e3   :  { %v560_v29 = vmax.f32 %v556_v20, 0.0  ;;  %v709_v31 = vmax.f32 %v705_v21, 0.0 }
 0x1e4   :  { %v561_v26 = vmax.f32 %v558_v24, 0.0  ;;  %v710_v28 = vmax.f32 %v707_v25, 0.0 }
 0x1e6   :  { %839 = vmatprep.mubr.f32.mxu0 %v710_v28  ;;  %909 = vmatprep.mubr.f32.mxu1 %v561_v26 }
 0x1e7   :  { %840 = vmatmul.mubr.f32.vlgmr.msra.gmra.mrb[4].mxu0 %v709_v31  ;;  %910 = vmatmul.mubr.f32.vlgmr.msra.gmra.mrb[4].mxu1 %v560_v29 }
 0x2ba   :  { %v972_v27 = vpop.f32.mrb[4].mxu0  ;;  %v1007_v32 = vpop.f32.mrb[4].mxu1 }
 0x2bb   :  { %v973_v33 = vpop.f32.mrb[5].mxu0  ;;  %v1008_v30 = vpop.f32.mrb[5].mxu1 }
 0x2bc   :  { %v974_v34 = vadd.f32 %v973_v33, %v972_v27  ;;  %v1009_v35 = vadd.f32 %v1008_v30, %v1007_v32 }
 0x2be   :  { %v912_v37 = vadd.f32 %v1009_v35, %v974_v34 }
 0x2c0   :  { %v922_v38 = vadd.f32 %v939_v36, %v912_v37 }
 0x2c2   :  { %924 = vst.msk [vmem:[%s1800_s11] sm:$0xff] %vm923_vm3, %v922_v38 }
 0x2c3   :  { %929 = vsyncpa [#allocation3], 1 }
 0x2c4   :  { %930 = vsyncpa [#allocation5], 1 }

</bundles_post_ra>
